<compile_context>
chip_gen: v7x
topology: tpu7x:2x2x1
jax: 0.10.0
libtpu: 0.0.40
codegen_flags: <defaults>
</compile_context>

<pallas_src>
import math
from functools import partial

import jax
import jax.numpy as jnp
from jax import lax
from jax.experimental import pallas as pl
from jax.experimental.pallas import tpu as pltpu


# ----------------------------- Pallas kernel ------------------------------ #

def _performer_kernel(kmax_ref, q_ref, k_ref, v_ref, proj_ref, o_ref, *, nb_features):
    # kmax_ref: (1,) f32 in SMEM (scalar prefetch) -- global max of (c*k) @ P^T logits.
    # q_ref/k_ref/v_ref/o_ref: (1, N, D) VMEM blocks for one (batch, head).
    # proj_ref: (Mp, D) VMEM block (zero-padded rows beyond nb_features), constant across grid.
    N = q_ref.shape[1]
    D = q_ref.shape[2]
    Mp = proj_ref.shape[0]

    c = float(D) ** (-0.25)                # data_normalizer
    ratio = float(nb_features) ** (-0.5)   # nb_features ** -0.5 (real M, not padded)
    eps = 1e-4
    hi = lax.Precision.HIGHEST

    kmax = kmax_ref[0]                     # global key-logit max (scalar)

    q = q_ref[0]                           # (N, D)
    k = k_ref[0]                           # (N, D)
    v = v_ref[0]                           # (N, D)
    proj = proj_ref[...]                   # (Mp, D)

    # (c * x) @ P^T  -> (N, Mp)
    qd = lax.dot_general(q * c, proj, (((1,), (1,)), ((), ())),
                         preferred_element_type=jnp.float32, precision=hi)
    kd = lax.dot_general(k * c, proj, (((1,), (1,)), ((), ())),
                         preferred_element_type=jnp.float32, precision=hi)

    diag_q = jnp.sum(q * q, axis=-1, keepdims=True) * (0.5 * c * c)   # (N, 1)
    diag_k = jnp.sum(k * k, axis=-1, keepdims=True) * (0.5 * c * c)   # (N, 1)

    if Mp != nb_features:
        # Padded projection rows produce logit 0; exclude them from the per-row max and
        # zero their feature columns after the +eps so they never contribute downstream.
        col = lax.broadcasted_iota(jnp.int32, (1, Mp), 1)
        valid = col < nb_features                                      # (1, Mp)
        q_row_max = jnp.max(jnp.where(valid, qd, -jnp.inf), axis=-1, keepdims=True)
    else:
        valid = None
        q_row_max = jnp.max(qd, axis=-1, keepdims=True)

    # softmax_kernel: query uses per-row max, key uses the global max.
    q_prime = ratio * (jnp.exp(qd - diag_q - q_row_max) + eps)         # (N, Mp)
    k_prime = ratio * (jnp.exp(kd - diag_k - kmax) + eps)              # (N, Mp)
    if valid is not None:
        q_prime = jnp.where(valid, q_prime, 0.0)
        k_prime = jnp.where(valid, k_prime, 0.0)

    # linear_attention
    k_cumsum = jnp.sum(k_prime, axis=0, keepdims=True)                 # (1, Mp)
    denom = jnp.sum(q_prime * k_cumsum, axis=-1, keepdims=True)        # (N, 1)
    d_inv = pl.reciprocal(denom, approx=True)                          # EUP slot

    context = lax.dot_general(k_prime, v, (((0,), (0,)), ((), ())),
                              preferred_element_type=jnp.float32, precision=hi)   # (Mp, D)
    out = lax.dot_general(q_prime, context, (((1,), (0,)), ((), ())),
                          preferred_element_type=jnp.float32, precision=hi)       # (N, D)

    o_ref[0] = (out * d_inv).astype(o_ref.dtype)


def fast_attention(q, k, v, projection_matrix):
    B, H, N, D = q.shape
    M = projection_matrix.shape[0]
    Mp = ((M + 127) // 128) * 128          # pad nb_features up to a lane-aligned width
    G = B * H

    c = float(D) ** (-0.25)
    proj_f32 = projection_matrix.astype(jnp.float32)

    # Global key-logit max (torch.max(data_dash)) hoisted out of the kernel: a cheap XLA
    # reduction over the *real* features, fed to the kernel as a scalar in SMEM.
    kmax = jnp.max(
        jnp.einsum('bhnd,md->bhnm', k.astype(jnp.float32) * c, proj_f32,
                   precision=lax.Precision.HIGHEST)
    ).astype(jnp.float32).reshape(1)

    proj_padded = jnp.pad(proj_f32, ((0, Mp - M), (0, 0)))

    # Collapse (B, H) into a single fully-parallel grid axis.
    qg = q.reshape(G, N, D)
    kg = k.reshape(G, N, D)
    vg = v.reshape(G, N, D)

    kernel = partial(_performer_kernel, nb_features=M)

    # index_maps receive the scalar-prefetch ref as a trailing positional arg.
    qkv_spec = pl.BlockSpec((1, N, D), lambda g, kmax_ref: (g, 0, 0))
    proj_spec = pl.BlockSpec((Mp, D), lambda g, kmax_ref: (0, 0))   # constant block -> DMA'd once

    out = pl.pallas_call(
        kernel,
        out_shape=jax.ShapeDtypeStruct((G, N, D), q.dtype),
        grid_spec=pltpu.PrefetchScalarGridSpec(
            num_scalar_prefetch=1,
            grid=(G,),
            in_specs=[qkv_spec, qkv_spec, qkv_spec, proj_spec],
            out_specs=pl.BlockSpec((1, N, D), lambda g, kmax_ref: (g, 0, 0)),
        ),
        compiler_params=pltpu.CompilerParams(
            dimension_semantics=("parallel",),
            vmem_limit_bytes=64 * 1024 * 1024,
        ),
    )(kmax, qg, kg, vg, proj_padded)

    return out.reshape(B, H, N, D)


# --------------------- parameter init (deterministic) --------------------- #

def _orthogonal_matrix_chunk(key, cols):
    block = jax.random.normal(key, (cols, cols), dtype=jnp.float32)
    qm, _ = jnp.linalg.qr(block)
    return qm.T


def gaussian_orthogonal_random_matrix(key, nb_rows, nb_columns, scaling=0):
    nb_full_blocks = nb_rows // nb_columns
    keys = jax.random.split(key, nb_full_blocks + 2)
    blocks = []
    for i in range(nb_full_blocks):
        blocks.append(_orthogonal_matrix_chunk(keys[i], nb_columns))
    remaining = nb_rows - nb_full_blocks * nb_columns
    if remaining > 0:
        qm = _orthogonal_matrix_chunk(keys[nb_full_blocks], nb_columns)
        blocks.append(qm[:remaining])
    final = jnp.concatenate(blocks, axis=0)
    if scaling == 0:
        multiplier = jnp.linalg.norm(
            jax.random.normal(keys[-1], (nb_rows, nb_columns), dtype=jnp.float32), axis=1)
    elif scaling == 1:
        multiplier = math.sqrt(float(nb_columns)) * jnp.ones((nb_rows,), dtype=jnp.float32)
    else:
        raise ValueError(f"Invalid scaling {scaling}")
    return multiplier[:, None] * final


# ----------------------------- JAX reference ------------------------------ #

def _softmax_kernel_ref(data, proj, is_query, eps=1e-4):
    d = data.shape[-1]
    c = d ** (-0.25)
    ratio = proj.shape[0] ** (-0.5)
    data_dash = jnp.einsum('bhid,jd->bhij', c * data, proj,
                           precision=lax.Precision.HIGHEST)
    diag = (jnp.sum(data ** 2, axis=-1) / 2.0 * c ** 2)[..., None]
    if is_query:
        out = ratio * (jnp.exp(data_dash - diag
                               - jnp.max(data_dash, axis=-1, keepdims=True)) + eps)
    else:
        out = ratio * (jnp.exp(data_dash - diag - jnp.max(data_dash)) + eps)
    return out


def fast_attention_ref(q, k, v, proj):
    qp = _softmax_kernel_ref(q, proj, is_query=True)
    kp = _softmax_kernel_ref(k, proj, is_query=False)
    k_cumsum = kp.sum(axis=-2)
    d_inv = 1.0 / jnp.einsum('bhnd,bhd->bhn', qp, k_cumsum,
                             precision=lax.Precision.HIGHEST)
    context = jnp.einsum('bhnd,bhne->bhde', kp, v, precision=lax.Precision.HIGHEST)
    return jnp.einsum('bhde,bhnd,bhn->bhne', context, qp, d_inv,
                      precision=lax.Precision.HIGHEST)


# ---------------------------------- main ----------------------------------- #

if __name__ == "__main__":
    B, H, N, D = 2, 2, 8, 16
    M = int(D * math.log(D))  # module default nb_features = int(dim_heads * ln dim_heads)

    key = jax.random.PRNGKey(0)
    kq, kk, kv, kp = jax.random.split(key, 4)
    q = jax.random.normal(kq, (B, H, N, D), dtype=jnp.float32)
    k = jax.random.normal(kk, (B, H, N, D), dtype=jnp.float32)
    v = jax.random.normal(kv, (B, H, N, D), dtype=jnp.float32)
    projection_matrix = gaussian_orthogonal_random_matrix(kp, M, D, scaling=0)

    out = fast_attention(q, k, v, projection_matrix)
    out = jax.block_until_ready(out)

    ref = fast_attention_ref(q, k, v, projection_matrix)
    assert out.shape == (B, H, N, D)
    # slightly looser than 1e-3 to accommodate the approximate (EUP) reciprocal
    assert jnp.allclose(out, ref, rtol=2e-3, atol=2e-3)

    print("KERNEL_OK")
</pallas_src>

<mosaic_0001>
module attributes {stable_mosaic.version = 11 : i64} {
  func.func @_performer_kernel(%arg0: i32, %arg1: memref<1xf32, #tpu.memory_space<smem>>, %arg2: memref<1x8x16xf32, #tpu.memory_space<vmem>>, %arg3: memref<1x8x16xf32, #tpu.memory_space<vmem>>, %arg4: memref<1x8x16xf32, #tpu.memory_space<vmem>>, %arg5: memref<128x16xf32, #tpu.memory_space<vmem>>, %arg6: memref<1x8x16xf32, #tpu.memory_space<vmem>>) attributes {dimension_semantics = [#tpu.dimension_semantics<parallel>], iteration_bounds = array<i64: 4>, scalar_prefetch = 1 : i64, scratch_operands = 0 : i64, tpu.core_type = #tpu.core_type<tc>, window_params = [{transform_indices = @transform_0, window_bounds = array<i64: 1, 8, 16>}, {transform_indices = @transform_1, window_bounds = array<i64: 1, 8, 16>}, {transform_indices = @transform_2, window_bounds = array<i64: 1, 8, 16>}, {pipeline_mode = #tpu.pipeline_mode<synchronous>, transform_indices = @transform_3, window_bounds = array<i64: 128, 16>}, {transform_indices = @transform_4, window_bounds = array<i64: 1, 8, 16>}]} {
    %c0 = arith.constant 0 : index
    %0 = memref.load %arg1[%c0] : memref<1xf32, #tpu.memory_space<smem>>
    %c0_0 = arith.constant 0 : index
    %c0_1 = arith.constant 0 : index
    %c0_2 = arith.constant 0 : index
    %1 = vector.load %arg2[%c0_0, %c0_1, %c0_2] : memref<1x8x16xf32, #tpu.memory_space<vmem>>, vector<1x8x16xf32>
    %2 = vector.shape_cast %1 : vector<1x8x16xf32> to vector<8x16xf32>
    %c0_3 = arith.constant 0 : index
    %c0_4 = arith.constant 0 : index
    %c0_5 = arith.constant 0 : index
    %3 = vector.load %arg3[%c0_3, %c0_4, %c0_5] : memref<1x8x16xf32, #tpu.memory_space<vmem>>, vector<1x8x16xf32>
    %4 = vector.shape_cast %3 : vector<1x8x16xf32> to vector<8x16xf32>
    %c0_6 = arith.constant 0 : index
    %c0_7 = arith.constant 0 : index
    %c0_8 = arith.constant 0 : index
    %5 = vector.load %arg4[%c0_6, %c0_7, %c0_8] : memref<1x8x16xf32, #tpu.memory_space<vmem>>, vector<1x8x16xf32>
    %6 = vector.shape_cast %5 : vector<1x8x16xf32> to vector<8x16xf32>
    %c0_9 = arith.constant 0 : index
    %c0_10 = arith.constant 0 : index
    %7 = vector.load %arg5[%c0_9, %c0_10] : memref<128x16xf32, #tpu.memory_space<vmem>>, vector<128x16xf32>
    %cst = arith.constant 5.000000e-01 : f32
    %8 = vector.broadcast %cst : f32 to vector<8x16xf32>
    %9 = arith.mulf %2, %8 : vector<8x16xf32>
    %cst_11 = arith.constant dense<0.000000e+00> : vector<8x128xf32>
    %10 = tpu.matmul %9, %7, %cst_11 {dimension_numbers = #tpu.dot_dimension_numbers<[1], [1], [0], [0], [0, 0, 1, 0], [], []>, precision = #tpu.contract_precision<fp32>} : vector<8x16xf32>, vector<128x16xf32>, vector<8x128xf32> -> vector<8x128xf32>
    %cst_12 = arith.constant 5.000000e-01 : f32
    %11 = vector.broadcast %cst_12 : f32 to vector<8x16xf32>
    %12 = arith.mulf %4, %11 : vector<8x16xf32>
    %cst_13 = arith.constant dense<0.000000e+00> : vector<8x128xf32>
    %13 = tpu.matmul %12, %7, %cst_13 {dimension_numbers = #tpu.dot_dimension_numbers<[1], [1], [0], [0], [0, 0, 1, 0], [], []>, precision = #tpu.contract_precision<fp32>} : vector<8x16xf32>, vector<128x16xf32>, vector<8x128xf32> -> vector<8x128xf32>
    %14 = arith.mulf %2, %2 : vector<8x16xf32>
    %cst_14 = arith.constant dense<0.000000e+00> : vector<8xf32>
    %15 = vector.multi_reduction <add>, %14, %cst_14 [1] : vector<8x16xf32> to vector<8xf32>
    %16 = vector.shape_cast %15 : vector<8xf32> to vector<8x1xf32>
    %cst_15 = arith.constant 1.250000e-01 : f32
    %17 = vector.broadcast %cst_15 : f32 to vector<8x1xf32>
    %18 = arith.mulf %16, %17 : vector<8x1xf32>
    %19 = arith.mulf %4, %4 : vector<8x16xf32>
    %cst_16 = arith.constant dense<0.000000e+00> : vector<8xf32>
    %20 = vector.multi_reduction <add>, %19, %cst_16 [1] : vector<8x16xf32> to vector<8xf32>
    %21 = vector.shape_cast %20 : vector<8xf32> to vector<8x1xf32>
    %cst_17 = arith.constant 1.250000e-01 : f32
    %22 = vector.broadcast %cst_17 : f32 to vector<8x1xf32>
    %23 = arith.mulf %21, %22 : vector<8x1xf32>
    %24 = tpu.iota {dimensions = array<i32: 1>} : vector<1x128xi32>
    %c44_i32 = arith.constant 44 : i32
    %25 = vector.broadcast %c44_i32 : i32 to vector<1x128xi32>
    %26 = arith.cmpi slt, %24, %25 : vector<1x128xi32>
    %cst_18 = arith.constant 0xFF800000 : f32
    %27 = vector.shape_cast %26 : vector<1x128xi1> to vector<1x128xi1>
    %28 = vector.broadcast %27 : vector<1x128xi1> to vector<8x128xi1>
    %29 = vector.broadcast %cst_18 : f32 to vector<8x128xf32>
    %30 = arith.select %28, %10, %29 : vector<8x128xi1>, vector<8x128xf32>
    %cst_19 = arith.constant dense<0xFF800000> : vector<8xf32>
    %31 = vector.multi_reduction <maximumf>, %30, %cst_19 [1] : vector<8x128xf32> to vector<8xf32>
    %32 = vector.shape_cast %31 : vector<8xf32> to vector<8x1xf32>
    %33 = vector.broadcast %18 : vector<8x1xf32> to vector<8x128xf32>
    %34 = arith.subf %10, %33 : vector<8x128xf32>
    %35 = vector.broadcast %32 : vector<8x1xf32> to vector<8x128xf32>
    %36 = arith.subf %34, %35 : vector<8x128xf32>
    %37 = math.exp %36 : vector<8x128xf32>
    %cst_20 = arith.constant 9.99999974E-5 : f32
    %38 = vector.broadcast %cst_20 : f32 to vector<8x128xf32>
    %39 = arith.addf %37, %38 : vector<8x128xf32>
    %cst_21 = arith.constant 0.150755674 : f32
    %40 = vector.broadcast %cst_21 : f32 to vector<8x128xf32>
    %41 = arith.mulf %40, %39 : vector<8x128xf32>
    %42 = vector.broadcast %23 : vector<8x1xf32> to vector<8x128xf32>
    %43 = arith.subf %13, %42 : vector<8x128xf32>
    %44 = vector.broadcast %0 : f32 to vector<8x128xf32>
    %45 = arith.subf %43, %44 : vector<8x128xf32>
    %46 = math.exp %45 : vector<8x128xf32>
    %cst_22 = arith.constant 9.99999974E-5 : f32
    %47 = vector.broadcast %cst_22 : f32 to vector<8x128xf32>
    %48 = arith.addf %46, %47 : vector<8x128xf32>
    %cst_23 = arith.constant 0.150755674 : f32
    %49 = vector.broadcast %cst_23 : f32 to vector<8x128xf32>
    %50 = arith.mulf %49, %48 : vector<8x128xf32>
    %cst_24 = arith.constant 0.000000e+00 : f32
    %51 = vector.shape_cast %26 : vector<1x128xi1> to vector<1x128xi1>
    %52 = vector.broadcast %51 : vector<1x128xi1> to vector<8x128xi1>
    %53 = vector.broadcast %cst_24 : f32 to vector<8x128xf32>
    %54 = arith.select %52, %41, %53 : vector<8x128xi1>, vector<8x128xf32>
    %cst_25 = arith.constant 0.000000e+00 : f32
    %55 = vector.shape_cast %26 : vector<1x128xi1> to vector<1x128xi1>
    %56 = vector.broadcast %55 : vector<1x128xi1> to vector<8x128xi1>
    %57 = vector.broadcast %cst_25 : f32 to vector<8x128xf32>
    %58 = arith.select %56, %50, %57 : vector<8x128xi1>, vector<8x128xf32>
    %cst_26 = arith.constant dense<0.000000e+00> : vector<128xf32>
    %59 = vector.multi_reduction <add>, %58, %cst_26 [0] : vector<8x128xf32> to vector<128xf32>
    %60 = vector.shape_cast %59 : vector<128xf32> to vector<1x128xf32>
    %61 = vector.broadcast %60 : vector<1x128xf32> to vector<8x128xf32>
    %62 = arith.mulf %54, %61 : vector<8x128xf32>
    %cst_27 = arith.constant dense<0.000000e+00> : vector<8xf32>
    %63 = vector.multi_reduction <add>, %62, %cst_27 [1] : vector<8x128xf32> to vector<8xf32>
    %64 = vector.shape_cast %63 : vector<8xf32> to vector<8x1xf32>
    %65 = tpu.reciprocal %64 {approx = true} : vector<8x1xf32> -> vector<8x1xf32>
    %cst_28 = arith.constant dense<0.000000e+00> : vector<128x16xf32>
    %66 = tpu.matmul %58, %6, %cst_28 {dimension_numbers = #tpu.dot_dimension_numbers<[0], [0], [1], [1], [0, 1, 1, 1], [], []>, precision = #tpu.contract_precision<fp32>} : vector<8x128xf32>, vector<8x16xf32>, vector<128x16xf32> -> vector<128x16xf32>
    %cst_29 = arith.constant dense<0.000000e+00> : vector<8x16xf32>
    %67 = tpu.matmul %54, %66, %cst_29 {dimension_numbers = #tpu.dot_dimension_numbers<[1], [0], [0], [1], [0, 0, 1, 1], [], []>, precision = #tpu.contract_precision<fp32>} : vector<8x128xf32>, vector<128x16xf32>, vector<8x16xf32> -> vector<8x16xf32>
    %68 = vector.broadcast %65 : vector<8x1xf32> to vector<8x16xf32>
    %69 = arith.mulf %67, %68 : vector<8x16xf32>
    %c0_30 = arith.constant 0 : index
    %c0_31 = arith.constant 0 : index
    %c0_32 = arith.constant 0 : index
    %70 = vector.load %arg6[%c0_30, %c0_31, %c0_32] : memref<1x8x16xf32, #tpu.memory_space<vmem>>, vector<1x8x16xf32>
    %71 = vector.shape_cast %70 : vector<1x8x16xf32> to vector<8x16xf32>
    %72 = vector.shape_cast %69 : vector<8x16xf32> to vector<1x8x16xf32>
    tpu.vector_store %arg6[%c0_30, %c0_31, %c0_32], %72 {strides = array<i32>} : memref<1x8x16xf32, #tpu.memory_space<vmem>>, vector<1x8x16xf32>,
    return
  }
  func.func @transform_0(%arg0: i32, %arg1: memref<1xf32, #tpu.memory_space<smem>>) -> (i32, i32, i32) {
    %c0_i32 = arith.constant 0 : i32
    %c0_i32_0 = arith.constant 0 : i32
    %c0_i32_1 = arith.constant 0 : i32
    return %arg0, %c0_i32, %c0_i32_0 : i32, i32, i32
  }
  func.func @transform_1(%arg0: i32, %arg1: memref<1xf32, #tpu.memory_space<smem>>) -> (i32, i32, i32) {
    %c0_i32 = arith.constant 0 : i32
    %c0_i32_0 = arith.constant 0 : i32
    %c0_i32_1 = arith.constant 0 : i32
    return %arg0, %c0_i32, %c0_i32_0 : i32, i32, i32
  }
  func.func @transform_2(%arg0: i32, %arg1: memref<1xf32, #tpu.memory_space<smem>>) -> (i32, i32, i32) {
    %c0_i32 = arith.constant 0 : i32
    %c0_i32_0 = arith.constant 0 : i32
    %c0_i32_1 = arith.constant 0 : i32
    return %arg0, %c0_i32, %c0_i32_0 : i32, i32, i32
  }
  func.func @transform_3(%arg0: i32, %arg1: memref<1xf32, #tpu.memory_space<smem>>) -> (i32, i32) {
    %c0_i32 = arith.constant 0 : i32
    %c0_i32_0 = arith.constant 0 : i32
    %c0_i32_1 = arith.constant 0 : i32
    return %c0_i32, %c0_i32_0 : i32, i32
  }
  func.func @transform_4(%arg0: i32, %arg1: memref<1xf32, #tpu.memory_space<smem>>) -> (i32, i32, i32) {
    %c0_i32 = arith.constant 0 : i32
    %c0_i32_0 = arith.constant 0 : i32
    %c0_i32_1 = arith.constant 0 : i32
    return %arg0, %c0_i32, %c0_i32_0 : i32, i32, i32
  }
}

</mosaic_0001>

<bundles_post_ra>
// kernel: tpu_custom_call.1
= control target key start
LH: loop header
LB: loop body
LE: loop exit
PB: predicated region body
PF: predicated region fallthrough
CT: control target
= control target key end

     0   :  { %s6950_s0 = inlined_call_operand.<no memory space> [shape: f32[1], index: 0, kind: input, shape index: {}]   ;;  %s6951_s1 = inlined_call_operand.hbm [shape: f32[4,8,16], index: 1, kind: input, shape index: {}]   ;;  %s6952_s2 = inlined_call_operand.hbm [shape: f32[4,8,16], index: 2, kind: input, shape index: {}]   ;;  %s6953_s3 = inlined_call_operand.hbm [shape: f32[4,8,16], index: 3, kind: input, shape index: {}]   ;;  %s6954_s4 = inlined_call_operand.hbm [shape: f32[128,16], index: 4, kind: input, shape index: {}]   ;;  %s6955_s5 = inlined_call_operand.hbm [shape: f32[4,8,16], index: 5, kind: output, shape index: {}]  }
   0x1   :  { %6974 = sst [smem:[#allocation22_spill]] %s6952_s2 }
   0x2   :  { %10 = sst [smem:[#allocation3]] %s6950_s0 }
   0x3   :  { %11 = vsyncpa [#allocation5], 0 }
   0x4   :  { %13 = vsyncpa [#allocation5 + $0x1], 0 }
   0x5   :  { %14 = vsyncpa [#allocation8], 0 }
   0x6   :  { %16 = vsyncpa [#allocation8 + $0x1], 0 }
   0x7   :  { %17 = vsyncpa [#allocation11], 0 }
   0x8   :  { %18 = vsyncpa [#allocation6], 0 }
   0x9   :  { %20 = vsyncpa [#allocation6 + $0x1], 0  ;;  %s5726_s20 = smov 0   ;;  %s5728_s21 = smov 0  }
   0xa   :  { %s5730_s22 = smov 0   ;;  %s5732_s23 = smov 0  }
   0xb LB: > { %6975 = sst [smem:[#allocation17_spill]] %s5669_s20  ;;  %s5747_s0 = sadd.s32 1, %s5681_s23   ;;  %s5681_s23 = sphi %s5732_s23, %s7007_s23   ;;  %s5677_s22 = sphi %s5730_s22, %s7011_s22   ;;  %s5673_s21 = sphi %s5728_s21, %s7010_s21   ;;  %s5669_s20 = sphi %s5726_s20, %s7009_s20  }
   0xc   : > { %6976 = sst [smem:[#allocation18_spill]] %s5681_s23  ;;  %s33_s24 = sadd.s32 1, %s5677_s22 }
   0xd   : > { %6977 = sst [smem:[#allocation19_spill]] %s5747_s0  ;;  %s30_s25 = ssub.s32 %s5681_s23, %s5747_s0 }
   0xe   : > { %p6956_p0 = scmp.ne.s32.totalorder %s5677_s22, %s5673_s21  ;;  %p31_p1 = scmp.eq.s32.totalorder %s30_s25, 0 }
   0xf   : > { %p41_p2 = scmp.eq.s32.totalorder %s5681_s23, 0  ;;  %p5442_p3 = scmp.lt.s32.totalorder %s5681_s23, 4 }
  0x10   : > { %s5757_s26 = scalar_select %p31_p1, %s5677_s22, %s33_s24  }
  0x11   : > { %p42_p4 = por %p41_p2, %p6956_p0  ;;  %s6957_s27 = sand.u32 1, %s5677_s22  }
  0x12   : > { %6978 = sst [smem:[#allocation20_spill]] %s5757_s26  ;;  %s5765_s28 = sshll.u32 %s6957_s27, 3 }
  0x13   : > { %s5768_s29 = sshll.u32 %s5681_s23, 7  ;;  %p5770_p5 = pnand %p5442_p3, %p42_p4 }
  0x14   : > { %s200_s6 = sand.u32 1, %s5681_s23   ;;  %s6980_s2 = sld [smem:[#allocation22_spill]] }
  0x15   : > { %s6979_s30 = scalar_select %p5770_p5, 1, 0 }
  0x16   : > { %s204_s10 = scalar_lea.vmem [#allocation7], %s5765_s28  ;;  %s5784_s12 = scalar_lea.sflag [#allocation8], %s200_s6 }
  0x17   : > { %s211_s11 = sshll.u32 %s204_s10, 4  ;;  %p5790_p7 = pneg %p5770_p5  ;;  %s5782_s11 = int_to_ptr.vmem [resolvable:$true] %s211_s11 }
  0x19   : > { %s6981_s14 = scalar_select %p5790_p7, 1, 0 }
  0x1a   : > { %s5779_s9 = scalar_lea.hbm %s6980_s2, %s5768_s29  ;;  %s5494_s17 = scalar_lea.hbm %s6980_s2, 512 }
  0x1b   : > { %s5489_s13 = scalar_lea.hbm %s5779_s9, 128  ;;  %p5495_p10 = scmp.lt.u32.totalorder %s5779_s9, %s6980_s2 }
  0x1c   : > { %p5490_p6 = scmp.ne.s32.totalorder %s5779_s9, %s5489_s13  ;;  %p5496_p11 = scmp.lt.u32.totalorder %s5494_s17, %s5489_s13 }
  0x1d   : > { %p5498_p13 = scmp.lt.u32.totalorder %s5489_s13, %s5779_s9 }
  0x1e   : > { %p5492_p8 = pnand %p5790_p7, %p5490_p6  ;;  %p5497_p12 = por %p5496_p11, %p5495_p10 }
  0x20   : > { %p5493_p9 = pneg %p5492_p8  ;;  %p5499_p1 = por %p5498_p13, %p5497_p12 }
  0x22   : > { %p5500_p2 = pnand %p5499_p1, %p5493_p9 }
  0x24   : > { %5503 = shalt.err (!%p5500_p2)
}
  0x25   : > { %s5504_s24 = scalar_lea.vmem %s5782_s11, 128  ;;  %s5683_s25 = smov [#allocation7]  }
  0x26   : > { %p5505_p3 = scmp.ne.s32.totalorder %s5782_s11, %s5504_s24  ;;  %s5509_s6 = sshll.u32 %s5683_s25, 4  ;;  %s5510_s6 = int_to_ptr.vmem [resolvable:$false] %s5509_s6 }
  0x27   : > { %s5511_s7 = scalar_lea.vmem %s5510_s6, 256  ;;  %p5512_p8 = scmp.lt.s32.totalorder %s5782_s11, %s5510_s6 }
  0x28   : > { %p5507_p4 = pnand %p5505_p3, %p5790_p7  ;;  %p5513_p0 = scmp.lt.s32.totalorder %s5511_s7, %s5504_s24 }
  0x2a   : > { %p5508_p6 = pneg %p5507_p4  ;;  %p5514_p10 = por %p5513_p0, %p5512_p8 }
  0x2c   : > { %p5515_p11 = pnand %p5514_p10, %p5508_p6 }
  0x2e   : > { %5518 = shalt.err (!%p5515_p11)
}
  0x2f   : > { %5433 = dma.hbm_to_vmem [thread:$0]  (!%p5770_p5), %s5779_s9, 128, %s5782_s11, %s5784_s12  }
  0x30   : > { %s5815_s8 = sadd.s32 4294967295, %s5681_s23   ;;  %s3655_s10 = sadd.s32 4294967294, %s5681_s23  }
  0x31   : > { %p46_p0 = scmp.ne.s32.totalorder %s5673_s21, %s5669_s20  ;;  %p6961_p9 = scmp.eq.s32.totalorder %s5815_s8, 0 }
  0x32   : > { %p143_p12 = scmp.eq.s32.totalorder %s5815_s8, 3  ;;  %p149_p13 = scmp.eq.s32.totalorder %s3655_s10, 3 }
  0x33   : > { %p5824_p1 = por %p6961_p9, %p46_p0  ;;  %p3656_p2 = scmp.ge.s32.totalorder %s5681_s23, 1 }
  0x34   : > { %p6983_p3 = scmp.ne.s32.totalorder %s5677_s22, %s5673_s21  ;;  %p5836_p6 = por %p149_p13, %p46_p0 }
  0x35   : > { %s6982_s13 = scalar_select %p5824_p1, 1, 0 }
  0x36   : > { %p5832_p4 = por %p143_p12, %p6983_p3  ;;  %p156_p8 = scmp.lt.s32.totalorder %s5681_s23, 5 }
  0x37   : > { %s6985_s11 = scalar_select %p5836_p6, 1, 0 }
  0x38   : > { %s6984_s9 = scalar_select %p5832_p4, 1, 0 }
  0x39   : > { %6986 = sst [smem:[#allocation21_spill]] %s6985_s11  ;;  %p5841_p10 = pnand %p3656_p2, %p156_p8 }
  0x3a   : > { %s5684_s16 = smov [#allocation10]   ;;  %s5853_s24 = scalar_lea.hbm %s6951_s1, %s5768_s29 }
  0x3b   : > { %s6987_s15 = scalar_select %p5841_p10, 1, 0 }
  0x3c   : > { %s168_s17 = sshll.u32 %s5684_s16, 4  ;;  %p5423_p11 = pneg %p5841_p10  ;;  %s5845_s17 = int_to_ptr.vmem [resolvable:$true] %s168_s17 }
  0x3d   : > { %s186_s6 = scalar_lea.vmem [#allocation4], %s5765_s28  ;;  %s5868_s27 = scalar_lea.hbm %s6953_s3, %s5768_s29 }
  0x3e   : > { %p5857_p0 = pnand %p5423_p11, %p6961_p9  ;;  %s193_s7 = sshll.u32 %s186_s6, 4  ;;  %s5862_s7 = int_to_ptr.vmem [resolvable:$true] %s193_s7 }
  0x3f   : > { %s5519_s18 = scalar_lea.hbm %s6954_s4, 2048 }
  0x40   : > { %p5520_p12 = scmp.ne.s32.totalorder %s6954_s4, %s5519_s18  ;;  %p5521_p13 = pneg %p5857_p0 }
  0x41   : > { %p5526_p8 = scmp.lt.u32.totalorder %s5519_s18, %s6954_s4 }
  0x42   : > { %p5522_p2 = pnand %p5521_p13, %p5520_p12 }
  0x44   : > { %p5523_p3 = pneg %p5522_p2 }
  0x46   : > { %p5528_p11 = pnand %p5526_p8, %p5523_p3 }
  0x48   : > { %5531 = shalt.err (!%p5528_p11)
}
  0x49   : > { %s5532_s29 = scalar_lea.vmem %s5845_s17, 2048  ;;  %p5540_p1 = scmp.lt.s32.totalorder %s5845_s17, %s5845_s17 }
  0x4a   : > { %p5533_p9 = scmp.ne.s32.totalorder %s5845_s17, %s5532_s29  ;;  %p5541_p10 = scmp.lt.s32.totalorder %s5532_s29, %s5532_s29 }
  0x4c   : > { %p5535_p6 = pnand %p5533_p9, %p5521_p13  ;;  %p5542_p5 = por %p5541_p10, %p5540_p1 }
  0x4e   : > { %p5536_p4 = pneg %p5535_p6 }
  0x50   : > { %p5543_p7 = pnand %p5542_p5, %p5536_p4 }
  0x52   : > { %5546 = shalt.err (!%p5543_p7)
}
  0x53   : > { %s5685_s2 = smov 128   ;;  %s5686_s0 = smov 8  }
  0x54   : > { %5426 = dma.hbm_to_vmem [thread:$0]  (!%p5857_p0), %s6954_s4, 2048, %s5845_s17, [#allocation11], %s5685_s2, %s5685_s2, %s5686_s0  }
  0x55   : > { %s6989_s10 = sand.u32 1, %s5677_s22   ;;  %s5547_s18 = scalar_lea.hbm %s5853_s24, 128 }
  0x56   : > { %s183_s16 = scalar_lea.sflag [#allocation5], %s6989_s10  ;;  %p5548_p5 = scmp.ne.s32.totalorder %s5853_s24, %s5547_s18 }
  0x57   : > { %p6990_p7 = scmp.ne.s32.totalorder %s6981_s14, 0  ;;  %s5552_s29 = scalar_lea.hbm %s6951_s1, 512 }
  0x58   : > { %p5553_p4 = scmp.lt.u32.totalorder %s5853_s24, %s6951_s1  ;;  %p5554_p6 = scmp.lt.u32.totalorder %s5552_s29, %s5547_s18 }
  0x59   : > { %p5550_p9 = pnand %p5548_p5, %p6990_p7  ;;  %p5556_p12 = scmp.lt.u32.totalorder %s5547_s18, %s5853_s24 }
  0x5a   : > { %p5555_p10 = por %p5554_p6, %p5553_p4 }
  0x5b   : > { %p5551_p1 = pneg %p5550_p9 }
  0x5c   : > { %p5557_p13 = por %p5556_p12, %p5555_p10 }
  0x5e   : > { %p5558_p0 = pnand %p5557_p13, %p5551_p1 }
  0x60   : > { %5561 = shalt.err (!%p5558_p0)
}
  0x61   : > { %s5562_s17 = scalar_lea.vmem %s5862_s7, 128  ;;  %s5687_s25 = smov [#allocation4]  }
  0x62   : > { %p5563_p2 = scmp.ne.s32.totalorder %s5862_s7, %s5562_s17  ;;  %s5567_s2 = sshll.u32 %s5687_s25, 4  ;;  %s5568_s2 = int_to_ptr.vmem [resolvable:$false] %s5567_s2 }
  0x63   : > { %s5569_s20 = scalar_lea.vmem %s5568_s2, 256  ;;  %p5570_p11 = scmp.lt.s32.totalorder %s5862_s7, %s5568_s2 }
  0x64   : > { %p5565_p3 = pnand %p5563_p2, %p6990_p7  ;;  %p5571_p5 = scmp.lt.s32.totalorder %s5569_s20, %s5562_s17 }
  0x66   : > { %p5566_p8 = pneg %p5565_p3  ;;  %p5572_p9 = por %p5571_p5, %p5570_p11 }
  0x68   : > { %p5573_p4 = pnand %p5572_p9, %p5566_p8 }
  0x6a   : > { %5576 = shalt.err (!%p5573_p4)
}
  0x6b   : > { %p6991_p1 = scmp.ne.s32.totalorder %s6979_s30, 0  ;;  %s222_s23 = scalar_lea.vmem [#allocation9], %s5765_s28 }
  0x6c   : > { %s229_s0 = sshll.u32 %s222_s23, 4  ;;  %s5577_s26 = scalar_lea.hbm %s5868_s27, 128  ;;  %s230_s0 = int_to_ptr.vmem [resolvable:$true] %s229_s0 }
  0x6d   : > { %5430 = dma.hbm_to_vmem [thread:$0]  (!%p6991_p1), %s5853_s24, 128, %s5862_s7, %s183_s16  }
  0x6e   : > { %p5578_p6 = scmp.ne.s32.totalorder %s5868_s27, %s5577_s26  ;;  %s5582_s18 = scalar_lea.hbm %s6953_s3, 512 }
  0x6f   : > { %p5583_p13 = scmp.lt.u32.totalorder %s5868_s27, %s6953_s3  ;;  %p5584_p0 = scmp.lt.u32.totalorder %s5582_s18, %s5577_s26 }
  0x70   : > { %p5580_p10 = pnand %p5578_p6, %p6990_p7  ;;  %p5586_p3 = scmp.lt.u32.totalorder %s5577_s26, %s5868_s27 }
  0x71   : > { %p5585_p2 = por %p5584_p0, %p5583_p13 }
  0x72   : > { %p5581_p12 = pneg %p5580_p10 }
  0x73   : > { %p5587_p8 = por %p5586_p3, %p5585_p2 }
  0x75   : > { %p5588_p11 = pnand %p5587_p8, %p5581_p12 }
  0x77   : > { %5591 = shalt.err (!%p5588_p11)
}
  0x78   : > { %s5592_s28 = scalar_lea.vmem %s230_s0, 128  ;;  %s5688_s24 = smov [#allocation9]  }
  0x79   : > { %p5593_p5 = scmp.ne.s32.totalorder %s230_s0, %s5592_s28  ;;  %s5597_s7 = sshll.u32 %s5688_s24, 4  ;;  %s5598_s7 = int_to_ptr.vmem [resolvable:$false] %s5597_s7 }
  0x7a   : > { %s5599_s16 = scalar_lea.vmem %s5598_s7, 256  ;;  %p5600_p6 = scmp.lt.s32.totalorder %s230_s0, %s5598_s7 }
  0x7b   : > { %p5595_p9 = pnand %p5593_p5, %p6990_p7  ;;  %p5601_p10 = scmp.lt.s32.totalorder %s5599_s16, %s5592_s28 }
  0x7d   : > { %p5596_p4 = pneg %p5595_p9  ;;  %p5602_p1 = por %p5601_p10, %p5600_p6 }
  0x7f   : > { %p5603_p0 = pnand %p5602_p1, %p5596_p4 }
  0x81   : > { %5606 = shalt.err (!%p5603_p0)
}
  0x82   : > { %p6992_p13 = scmp.ne.s32.totalorder %s6979_s30, 0  ;;  %p6993_p12 = scmp.ne.s32.totalorder %s6987_s15, 0 }
  0x83   : > { %s5936_s14 = sand.u32 (!%p6993_p12), 1, %s5673_s21   ;;  %p6994_p7 = scmp.ne.s32.totalorder (!%p6993_p12), %s6982_s13, 0 }
  0x84   : > { %5436 = dma.hbm_to_vmem [thread:$0]  (!%p6992_p13), %s5868_s27, 128, %s230_s0, %s5784_s12  }
  0x85   : > { %238 = sbr.rel (%p6993_p12) target bundleno = 1738 (0x6ca), region = 36  ;;  %s5939_s29 = sshll.u32 (!%p6993_p12), %s5936_s14, 3 }
  0x86   : > { %s241_s17 = scalar_lea.sflag (!%p6993_p12), [#allocation5], %s5936_s14  ;;  %s244_s25 = scalar_lea.vmem (!%p6993_p12), [#allocation4], %s5939_s29 }
  0x8c   : > { %5652 = dma.done.wait (%p6994_p7), %s241_s17, 128  }
  0x8d   : > { %5654 = vsyncadd (%p6994_p7), %s241_s17, 4294967168  ;;  %s249_s27 = sand.u32 1, %s5815_s8   ;;  %s253_s12 = scalar_lea.vmem [#allocation7], %s5939_s29 }
  0x8e   : > { %s250_s30 = scalar_lea.sflag [#allocation8], %s249_s27 }
  0x8f   : > { %5656 = dma.done.wait (%p6994_p7), %s250_s30, 256  }
  0x90   : > { %5658 = vsyncadd (%p6994_p7), %s250_s30, 4294967040  ;;  %s262_s15 = scalar_lea.vmem [#allocation9], %s5939_s29  ;;  %p6995_p1 = scmp.eq.s32.totalorder %s5815_s8, 0 }
  0x92   : > { %5660 = dma.done.wait (%p6995_p1), [#allocation11], 2048   ;;  %p6996_p2 = pmov %p6995_p1 }
  0x93   : > { %v5689_v0 = vmov 0.0|0.0   ;;  %vm5690_vm0 = vmmov 0   ;;  %v5691_v1 = vmov 0.0   ;;  %vm322_vm1 = vcmask 130048   ;;  %v305_v2 = vld [vmem:[#allocation10] sm:$0xff]  ;;  %v306_v3 = vld [vmem:[#allocation10 + $0x8] sm:$0xff] }
  0x94   : > { %5662 = vsyncadd (%p6996_p2), [#allocation11], 4294965248  ;;  %4869 = vmatprep.subr.bf16.mxu0 %v5689_v0  ;;  %5013 = vmatprep.subr.bf16.mxu1 %v5689_v0  ;;  %v307_v4 = vld [vmem:[#allocation10 + $0x10] sm:$0xff]  ;;  %v327_v5 = vsel %vm322_vm1, %v305_v2, 0  ;;  %v330_v6 = vsel %vm322_vm1, %v306_v3, 0  ;;  %v308_v7 = vld [vmem:[#allocation10 + $0x18] sm:$0xff] }
  0x95   : > { %4115 = vmatprep.mubr.msk.f32.mxu0 %vm5690_vm0, %v5691_v1  ;;  %4325 = vmatprep.mubr.msk.f32.mxu1 %vm5690_vm0, %v5691_v1  ;;  %v375_v8 = vand.u32 4294901760, %v327_v5  ;;  %v378_v9 = vand.u32 4294901760, %v330_v6  ;;  %v333_v10 = vsel %vm322_vm1, %v307_v4, 0  ;;  %v336_v11 = vsel %vm322_vm1, %v308_v7, 0  ;;  %v309_v15 = vld [vmem:[#allocation10 + $0x20] sm:$0xff]  ;;  %v310_v16 = vld [vmem:[#allocation10 + $0x28] sm:$0xff] }
  0x96   : > { %v381_v13 = vand.u32 4294901760, %v333_v10  ;;  %v384_v14 = vand.u32 4294901760, %v336_v11  ;;  %v339_v18 = vsel %vm322_vm1, %v309_v15, 0  ;;  %v342_v19 = vsel %vm322_vm1, %v310_v16, 0  ;;  %v311_v22 = vld [vmem:[#allocation10 + $0x30] sm:$0xff]  ;;  %v312_v23 = vld [vmem:[#allocation10 + $0x38] sm:$0xff] }
  0x97   : > { %v5968_v12 = vpack.c.bf16 %v378_v9, %v375_v8  ;;  %v387_v20 = vand.u32 4294901760, %v339_v18  ;;  %v390_v21 = vand.u32 4294901760, %v342_v19  ;;  %v345_v25 = vsel %vm322_vm1, %v311_v22, 0  ;;  %v313_v27 = vld [vmem:[#allocation10 + $0x40] sm:$0xff]  ;;  %v314_v28 = vld [vmem:[#allocation10 + $0x48] sm:$0xff]  ;;  %v315_v37 = vld [vmem:[#allocation10 + $0x50] sm:$0xff] }
  0x98   : > { %v5974_v17 = vpack.c.bf16 %v384_v14, %v381_v13  ;;  %v348_v26 = vsel %vm322_vm1, %v312_v23, 0  ;;  %v393_v29 = vand.u32 4294901760, %v345_v25  ;;  %v351_v31 = vsel %vm322_vm1, %v313_v27, 0  ;;  %v316_v42 = vld [vmem:[#allocation10 + $0x58] sm:$0xff]  ;;  %v317_v58 = vld [vmem:[#allocation10 + $0x60] sm:$0xff]  ;;  %v318_v59 = vld [vmem:[#allocation10 + $0x68] sm:$0xff] }
  0x99   : > { %4871 = vmatpush3.bf16.xpose.msra.mxu0 %v5968_v12  ;;  %5015 = vmatpush3.bf16.xpose.msra.mxu1 %v5968_v12  ;;  %v5982_v24 = vpack.c.bf16 %v390_v21, %v387_v20  ;;  %v396_v30 = vand.u32 4294901760, %v348_v26  ;;  %v354_v32 = vsel %vm322_vm1, %v314_v28, 0  ;;  %v399_v34 = vand.u32 4294901760, %v351_v31  ;;  %v6052_v62 = vld [vmem:[%s244_s25] sm:$0xff]  ;;  %v6056_v63 = vld [vmem:[%s253_s12] sm:$0xff]  ;;  %s301_s13 = sld [smem:[#allocation3]] }
  0x9a   : > { %4872 = vmatprep.subr.bf16.mxu0 %v5689_v0  ;;  %5016 = vmatprep.subr.bf16.mxu1 %v5689_v0  ;;  %v402_v35 = vand.u32 4294901760, %v354_v32  ;;  %v5994_v36 = vsub.f32 %v327_v5, %v375_v8  ;;  %v5996_v38 = vsub.f32 %v330_v6, %v378_v9  ;;  %v5998_v39 = vsub.f32 %v333_v10, %v381_v13  ;;  %v319_v10 = vld [vmem:[#allocation10 + $0x70] sm:$0xff]  ;;  %s3672_s2 = sshll.u32 %s5815_s8, 7  ;;  %s300_s20 = scalar_lea.vmem [#allocation12], %s5939_s29 }
  0x9b   : > { %v5992_v33 = vpack.c.bf16 %v396_v30, %v393_v29  ;;  %v6000_v40 = vsub.f32 %v336_v11, %v384_v14  ;;  %v6002_v41 = vsub.f32 %v339_v18, %v387_v20  ;;  %v6004_v43 = vsub.f32 %v342_v19, %v390_v21  ;;  %v320_v11 = vld [vmem:[#allocation10 + $0x78] sm:$0xff]  ;;  %s3532_s23 = sshll.u32 %s300_s20, 4  ;;  %s6906_s11 = scalar_lea.hbm %s6955_s5, %s3672_s2  ;;  %s6908_s23 = int_to_ptr.vmem [resolvable:$true] %s3532_s23 }
  0x9c   : > { %v6006_v44 = vsub.f32 %v345_v25, %v393_v29  ;;  %v6008_v45 = vsub.f32 %v348_v26, %v396_v30  ;;  %v6010_v46 = vsub.f32 %v351_v31, %v399_v34  ;;  %v6014_v47 = vsub.f32 %v354_v32, %v402_v35  ;;  %s3519_s10 = scalar_lea.sflag [#allocation6], %s5936_s14  ;;  %s5607_s8 = scalar_lea.vmem %s6908_s23, 128 }
  0x9d   : > { %v6018_v48 = vpack.c.bf16 %v5996_v38, %v5994_v36  ;;  %v6022_v49 = vpack.c.bf16 %v6000_v40, %v5998_v39  ;;  %v357_v50 = vsel %vm322_vm1, %v315_v37, 0  ;;  %v360_v51 = vsel %vm322_vm1, %v316_v42, 0  ;;  %p5608_p3 = scmp.ne.s32.totalorder %s6908_s23, %s5607_s8  ;;  %p7002_p8 = scmp.ne.s32.totalorder %s6984_s9, 0 }
  0x9e   : > { %v6030_v52 = vpack.c.bf16 %v6004_v43, %v6002_v41  ;;  %v6034_v53 = vpack.c.bf16 %v6008_v45, %v6006_v44  ;;  %v6038_v54 = vpack.c.bf16 %v6014_v47, %v6010_v46  ;;  %v6040_v55 = vpack.c.bf16 %v402_v35, %v399_v34  ;;  %s5692_s18 = smov [#allocation12]  }
  0x9f   : > { %v405_v56 = vand.u32 4294901760, %v357_v50  ;;  %v408_v57 = vand.u32 4294901760, %v360_v51  ;;  %v363_v3 = vsel %vm322_vm1, %v317_v58, 0  ;;  %v366_v4 = vsel %vm322_vm1, %v318_v59, 0  ;;  %p5609_p11 = pnand %p5608_p3, %p7002_p8  ;;  %s5611_s19 = sshll.u32 %s5692_s18, 4  ;;  %s5612_s19 = int_to_ptr.vmem [resolvable:$false] %s5611_s19 }
  0xa0   : > { %v321_v6 = vmul.f32 0.5, %v6052_v62  ;;  %v1015_v7 = vmul.f32 0.5, %v6056_v63  ;;  %v411_v8 = vand.u32 4294901760, %v363_v3  ;;  %v414_v9 = vand.u32 4294901760, %v366_v4  ;;  %s5613_s6 = scalar_lea.vmem %s5612_s19, 256  ;;  %p5614_p9 = scmp.lt.s32.totalorder %s6908_s23, %s5612_s19 }
  0xa1   : > { %4874 = vmatpush3.bf16.xpose.msra.mxu0 %v5974_v17  ;;  %5018 = vmatpush3.bf16.xpose.msra.mxu1 %v5974_v17  ;;  %v6042_v60 = vsub.f32 %v357_v50, %v405_v56  ;;  %v6044_v61 = vsub.f32 %v360_v51, %v408_v57  ;;  %v6064_v5 = vpack.c.bf16 %v408_v57, %v405_v56  ;;  %v369_v19 = vsel %vm322_vm1, %v319_v10, 0  ;;  %p5610_p5 = pneg %p5609_p11  ;;  %p5615_p4 = scmp.lt.s32.totalorder %s5613_s6, %s5607_s8 }
  0xa2   : > { %4875 = vmatprep.subr.bf16.mxu0 %v5689_v0  ;;  %5019 = vmatprep.subr.bf16.mxu1 %v5689_v0  ;;  %v6068_v13 = vsub.f32 %v363_v3, %v411_v8  ;;  %v6070_v14 = vsub.f32 %v366_v4, %v414_v9  ;;  %v324_v15 = vsel %vm322_vm1, %v321_v6, 0  ;;  %v1017_v16 = vsel %vm322_vm1, %v1015_v7, 0 }
  0xa3   : > { %v6060_v2 = vpack.c.bf16 %v6044_v61, %v6042_v60  ;;  %v372_v20 = vsel %vm322_vm1, %v320_v11, 0  ;;  %v6084_v21 = vand.u32 4294901760, %v324_v15  ;;  %v6086_v22 = vand.u32 4294901760, %v1017_v16  ;;  %p5616_p6 = por %p5615_p4, %p5614_p9 }
  0xa4   : > { %v6080_v18 = vpack.c.bf16 %v6070_v14, %v6068_v13  ;;  %v6088_v23 = vpack.c.bf16 %v414_v9, %v411_v8  ;;  %v417_v25 = vand.u32 4294901760, %v369_v19  ;;  %v420_v26 = vand.u32 4294901760, %v372_v20 }
  0xa5   : > { %v6091_v27 = vsub.f32 %v324_v15, %v6084_v21  ;;  %v6094_v28 = vsub.f32 %v1017_v16, %v6086_v22  ;;  %v468_v31 = vand.u32 4294901760, %v5994_v36  ;;  %v475_v32 = vand.u32 4294901760, %v5996_v38  ;;  %p5617_p10 = pnand %p5616_p6, %p5610_p5 }
  0xa6   : > { %v6096_v29 = vsub.f32 %v369_v19, %v417_v25  ;;  %v6098_v30 = vsub.f32 %v372_v20, %v420_v26  ;;  %v6112_v42 = vpack.c.bf16 %v420_v26, %v417_v25  ;;  %v482_v3 = vand.u32 4294901760, %v5998_v39 }
  0xa7   : > { %v457_v35 = vand.u32 4294901760, %v6091_v27  ;;  %v1102_v37 = vand.u32 4294901760, %v6094_v28  ;;  %v469_v50 = vsub.f32 %v5994_v36, %v468_v31  ;;  %v476_v51 = vsub.f32 %v5996_v38, %v475_v32 }
  0xa8   : > { %v6108_v34 = vpack.c.bf16 %v6098_v30, %v6096_v29  ;;  %v489_v4 = vand.u32 4294901760, %v6000_v40  ;;  %v483_v9 = vsub.f32 %v5998_v39, %v482_v3  ;;  %v496_v16 = vand.u32 4294901760, %v6002_v41 }
  0xa9   : > { %4877 = vmatpush3.bf16.xpose.msra.mxu0 %v5982_v24  ;;  %5021 = vmatpush3.bf16.xpose.msra.mxu1 %v5982_v24  ;;  %v458_v56 = vsub.f32 %v6091_v27, %v457_v35  ;;  %v1103_v57 = vsub.f32 %v6094_v28, %v1102_v37  ;;  %v470_v58 = vand.u32 4294901760, %v469_v50  ;;  %v477_v59 = vand.u32 4294901760, %v476_v51 }
  0xaa   : > { %4878 = vmatprep.subr.bf16.mxu0 %v5689_v0  ;;  %5022 = vmatprep.subr.bf16.mxu1 %v5689_v0  ;;  %v490_v10 = vsub.f32 %v6000_v40, %v489_v4  ;;  %v484_v11 = vand.u32 4294901760, %v483_v9  ;;  %v503_v19 = vand.u32 4294901760, %v6004_v43  ;;  %v497_v25 = vsub.f32 %v6002_v41, %v496_v16 }
  0xab   : > { %v459_v6 = vand.u32 4294901760, %v458_v56  ;;  %v1104_v7 = vand.u32 4294901760, %v1103_v57  ;;  %v4894_v8 = vpack.c.bf16 %v477_v59, %v470_v58  ;;  %v510_v56 = vand.u32 4294901760, %v6006_v44 }
  0xac   : > { %v491_v15 = vand.u32 4294901760, %v490_v10  ;;  %v504_v26 = vsub.f32 %v6004_v43, %v503_v19  ;;  %v498_v50 = vand.u32 4294901760, %v497_v25  ;;  %v517_v57 = vand.u32 4294901760, %v6008_v45 }
  0xad   : > { %v511_v59 = vsub.f32 %v6006_v44, %v510_v56  ;;  %v524_v9 = vand.u32 4294901760, %v6010_v46  ;;  %v531_v10 = vand.u32 4294901760, %v6014_v47  ;;  %v6997_v41 = vand.u32 4294901760, %v6044_v61 }
  0xae   : > { %v4897_v20 = vpack.c.bf16 %v491_v15, %v484_v11  ;;  %v505_v51 = vand.u32 4294901760, %v504_v26  ;;  %v4975_v39 = vpack.c.bf16 %v517_v57, %v510_v56  ;;  %v6998_v44 = vand.u32 4294901760, %v6070_v14 }
  0xaf   : > { %v525_v15 = vsub.f32 %v6010_v46, %v524_v9  ;;  %v4978_v40 = vpack.c.bf16 %v531_v10, %v524_v9  ;;  %vm1735_vm3 = vcmask 64512  }
  0xb0   : > { %v4900_v58 = vpack.c.bf16 %v505_v51, %v498_v50  ;;  %v538_v50 = vand.u32 4294901760, %v6042_v60  ;;  %v6971_v51 = vand.u32 4294901760, %v6044_v61 }
  0xb1   : > { %4880 = vmatpush3.bf16.xpose.msra.mxu0 %v5992_v33  ;;  %5024 = vmatpush3.bf16.xpose.msra.mxu1 %v5992_v33  ;;  %v526_v25 = vand.u32 4294901760, %v525_v15  ;;  %v6972_v15 = vand.u32 4294901760, %v6070_v14 }
  0xb2   : > { %4881 = vmatprep.subr.bf16.mxu0 %v5689_v0  ;;  %5025 = vmatprep.subr.bf16.mxu1 %v5689_v0  ;;  %v4981_v43 = vpack.c.bf16 %v6997_v41, %v538_v50 }
  0xb9   : > { %4883 = vmatpush3.bf16.xpose.msra.mxu0 %v6040_v55  ;;  %5027 = vmatpush3.bf16.xpose.msra.mxu1 %v6040_v55 }
  0xba   : > { %4884 = vmatprep.subr.bf16.mxu0 %v5689_v0  ;;  %5028 = vmatprep.subr.bf16.mxu1 %v5689_v0 }
  0xc1   : > { %4886 = vmatpush3.bf16.xpose.msra.mxu0 %v6064_v5  ;;  %5030 = vmatpush3.bf16.xpose.msra.mxu1 %v6064_v5 }
  0xc2   : > { %4887 = vmatprep.subr.bf16.mxu0 %v5689_v0  ;;  %5031 = vmatprep.subr.bf16.mxu1 %v5689_v0 }
  0xc9   : > { %4889 = vmatpush3.bf16.xpose.msra.mxu0 %v6088_v23  ;;  %5033 = vmatpush3.bf16.xpose.msra.mxu1 %v6088_v23 }
  0xca   : > { %4890 = vmatprep.subr.bf16.mxu0 %v5689_v0  ;;  %5034 = vmatprep.subr.bf16.mxu1 %v5689_v0 }
  0xd1   : > { %4892 = vmatpush3.bf16.xpose.msra.mxu0 %v6112_v42  ;;  %5036 = vmatpush3.bf16.xpose.msra.mxu1 %v6112_v42 }
  0xd2   : > { %4893 = vmatprep.subr.bf16.mxu0 %v5689_v0  ;;  %5037 = vmatprep.subr.bf16.mxu1 %v5689_v0 }
  0xd8   : > { %4116 = vmatmul.mubr.f32.vlgmr.msra.gmra.mrb[0].mxu0 %v459_v6  ;;  %4326 = vmatmul.mubr.f32.vlgmr.msra.gmra.mrb[0].mxu1 %v1104_v7  ;;  %v518_v6 = vsub.f32 %v6008_v45, %v517_v57  ;;  %v512_v7 = vand.u32 4294901760, %v511_v59  ;;  %v539_v59 = vsub.f32 %v6042_v60, %v538_v50  ;;  %v1685_v60 = vstv %s301_s13 }
  0xd9   : > { %4895 = vmatpush3.bf16.xpose.msra.mxu0 %v4894_v8  ;;  %5039 = vmatpush3.bf16.xpose.msra.mxu1 %v4894_v8 }
  0xda   : > { %4896 = vmatprep.subr.bf16.mxu0 %v5689_v0  ;;  %5040 = vmatprep.subr.bf16.mxu1 %v5689_v0  ;;  %v519_v8 = vand.u32 4294901760, %v518_v6  ;;  %v546_v6 = vsub.f32 %v6044_v61, %v6971_v51  ;;  %v573_v51 = vand.u32 4294901760, %v6098_v30 }
  0xdb   : > { %4150 = vmatprep.mubr.msk.f32.mxu0 %vm5690_vm0, %v5691_v1  ;;  %4360 = vmatprep.mubr.msk.f32.mxu1 %vm5690_vm0, %v5691_v1 }
  0xdc   : > { %v4903_v11 = vpack.c.bf16 %v519_v8, %v512_v7  ;;  %v540_v7 = vand.u32 4294901760, %v539_v59  ;;  %v547_v8 = vand.u32 4294901760, %v546_v6  ;;  %v566_v6 = vand.u32 4294901760, %v6096_v29 }
  0xde   : > { %v4987_v46 = vpack.c.bf16 %v573_v51, %v566_v6 }
  0xe1   : > { %4898 = vmatpush3.bf16.xpose.msra.mxu0 %v4897_v20  ;;  %5042 = vmatpush3.bf16.xpose.msra.mxu1 %v4897_v20  ;;  %v532_v20 = vsub.f32 %v6014_v47, %v531_v10 }
  0xe2   : > { %4899 = vmatprep.subr.bf16.mxu0 %v5689_v0  ;;  %5043 = vmatprep.subr.bf16.mxu1 %v5689_v0 }
  0xe3   : > { %v533_v26 = vand.u32 4294901760, %v532_v20  ;;  %v4909_v20 = vpack.c.bf16 %v547_v8, %v540_v7  ;;  %v567_v8 = vsub.f32 %v6096_v29, %v566_v6 }
  0xe9   : > { %4901 = vmatpush3.bf16.xpose.msra.mxu0 %v4900_v58  ;;  %5045 = vmatpush3.bf16.xpose.msra.mxu1 %v4900_v58  ;;  %v4906_v58 = vpack.c.bf16 %v533_v26, %v526_v25  ;;  %v560_v26 = vsub.f32 %v6070_v14, %v6972_v15  ;;  %v574_v15 = vsub.f32 %v6098_v30, %v573_v51 }
  0xea   : > { %4902 = vmatprep.subr.bf16.mxu0 %v5689_v0  ;;  %5046 = vmatprep.subr.bf16.mxu1 %v5689_v0 }
  0xeb   : > { %v561_v59 = vand.u32 4294901760, %v560_v26 }
  0xf1   : > { %4904 = vmatpush3.bf16.xpose.msra.mxu0 %v4903_v11  ;;  %5048 = vmatpush3.bf16.xpose.msra.mxu1 %v4903_v11  ;;  %v552_v11 = vand.u32 4294901760, %v6068_v13 }
  0xf2   : > { %4905 = vmatprep.subr.bf16.mxu0 %v5689_v0  ;;  %5049 = vmatprep.subr.bf16.mxu1 %v5689_v0 }
  0xf3   : > { %v553_v25 = vsub.f32 %v6068_v13, %v552_v11  ;;  %v4984_v45 = vpack.c.bf16 %v6998_v44, %v552_v11 }
  0xf9   : > { %4907 = vmatpush3.bf16.xpose.msra.mxu0 %v4906_v58  ;;  %5051 = vmatpush3.bf16.xpose.msra.mxu1 %v4906_v58  ;;  %v554_v58 = vand.u32 4294901760, %v553_v25  ;;  %v575_v25 = vand.u32 4294901760, %v574_v15 }
  0xfa   : > { %4908 = vmatprep.subr.bf16.mxu0 %v5689_v0  ;;  %5052 = vmatprep.subr.bf16.mxu1 %v5689_v0 }
  0xfb   : > { %v4912_v7 = vpack.c.bf16 %v561_v59, %v554_v58 }
 0x101   : > { %4910 = vmatpush3.bf16.xpose.msra.mxu0 %v4909_v20  ;;  %5054 = vmatpush3.bf16.xpose.msra.mxu1 %v4909_v20  ;;  %v568_v20 = vand.u32 4294901760, %v567_v8 }
 0x102   : > { %4911 = vmatprep.subr.bf16.mxu0 %v5689_v0  ;;  %5055 = vmatprep.subr.bf16.mxu1 %v5689_v0 }
 0x103   : > { %v4915_v26 = vpack.c.bf16 %v575_v25, %v568_v20 }
 0x109   : > { %4913 = vmatpush3.bf16.xpose.msra.mxu0 %v4912_v7  ;;  %5057 = vmatpush3.bf16.xpose.msra.mxu1 %v4912_v7 }
 0x10a   : > { %4914 = vmatprep.subr.bf16.mxu0 %v5689_v0  ;;  %5058 = vmatprep.subr.bf16.mxu1 %v5689_v0 }
 0x111   : > { %4916 = vmatpush3.bf16.xpose.msra.mxu0 %v4915_v26  ;;  %5060 = vmatpush3.bf16.xpose.msra.mxu1 %v4915_v26 }
 0x112   : > { %4917 = vmatprep.subr.bf16.mxu0 %v5689_v0  ;;  %5061 = vmatprep.subr.bf16.mxu1 %v5689_v0 }
 0x118   : > { %4151 = vmatmul.mubr.f32.vlgmr.msra.gmra.mrb[0].mxu0 %v6084_v21  ;;  %4361 = vmatmul.mubr.f32.vlgmr.msra.gmra.mrb[0].mxu1 %v6086_v22 }
 0x119   : > { %4919 = vmatpush3.bf16.xpose.msra.mxu0 %v6018_v48  ;;  %5063 = vmatpush3.bf16.xpose.msra.mxu1 %v6018_v48  ;;  %v4966_v48 = vpack.c.bf16 %v475_v32, %v468_v31 }
 0x11a   : > { %4920 = vmatprep.subr.bf16.mxu0 %v5689_v0  ;;  %5064 = vmatprep.subr.bf16.mxu1 %v5689_v0 }
 0x11b   : > { %4185 = vmatprep.mubr.msk.f32.mxu0 %vm5690_vm0, %v5691_v1  ;;  %4395 = vmatprep.mubr.msk.f32.mxu1 %vm5690_vm0, %v5691_v1 }
 0x121   : > { %4922 = vmatpush3.bf16.xpose.msra.mxu0 %v6022_v49  ;;  %5066 = vmatpush3.bf16.xpose.msra.mxu1 %v6022_v49  ;;  %v1665_v49 = vmul.f32 %v6056_v63, %v6056_v63 }
 0x122   : > { %4923 = vmatprep.subr.bf16.mxu0 %v5689_v0  ;;  %5067 = vmatprep.subr.bf16.mxu1 %v5689_v0 }
 0x123   : > { %v1666_v36 = vsel %vm322_vm1, %v1665_v49, 0.0 }
 0x124   : > { %1667 = vadd.xlane.f32.xlu0 %v1666_v36 }
 0x129   : > { %4925 = vmatpush3.bf16.xpose.msra.mxu0 %v6030_v52  ;;  %5069 = vmatpush3.bf16.xpose.msra.mxu1 %v6030_v52  ;;  %v1660_v52 = vmul.f32 %v6052_v62, %v6052_v62 }
 0x12a   : > { %4926 = vmatprep.subr.bf16.mxu0 %v5689_v0  ;;  %5070 = vmatprep.subr.bf16.mxu1 %v5689_v0 }
 0x12b   : > { %v1661_v38 = vsel %vm322_vm1, %v1660_v52, 0.0 }
 0x12c   : > { %1662 = vadd.xlane.f32.xlu1 %v1661_v38 }
 0x131   : > { %4928 = vmatpush3.bf16.xpose.msra.mxu0 %v6034_v53  ;;  %5072 = vmatpush3.bf16.xpose.msra.mxu1 %v6034_v53  ;;  %v4969_v53 = vpack.c.bf16 %v489_v4, %v482_v3 }
 0x132   : > { %4929 = vmatprep.subr.bf16.mxu0 %v5689_v0  ;;  %5073 = vmatprep.subr.bf16.mxu1 %v5689_v0 }
 0x139   : > { %4931 = vmatpush3.bf16.xpose.msra.mxu0 %v6038_v54  ;;  %5075 = vmatpush3.bf16.xpose.msra.mxu1 %v6038_v54  ;;  %v4972_v54 = vpack.c.bf16 %v503_v19, %v496_v16 }
 0x13a   : > { %4932 = vmatprep.subr.bf16.mxu0 %v5689_v0  ;;  %5076 = vmatprep.subr.bf16.mxu1 %v5689_v0 }
 0x141   : > { %4934 = vmatpush3.bf16.xpose.msra.mxu0 %v6060_v2  ;;  %5078 = vmatpush3.bf16.xpose.msra.mxu1 %v6060_v2 }
 0x142   : > { %4935 = vmatprep.subr.bf16.mxu0 %v5689_v0  ;;  %5079 = vmatprep.subr.bf16.mxu1 %v5689_v0 }
 0x149   : > { %4937 = vmatpush3.bf16.xpose.msra.mxu0 %v6080_v18  ;;  %5081 = vmatpush3.bf16.xpose.msra.mxu1 %v6080_v18 }
 0x14a   : > { %4938 = vmatprep.subr.bf16.mxu0 %v5689_v0  ;;  %5082 = vmatprep.subr.bf16.mxu1 %v5689_v0 }
 0x151   : > { %4940 = vmatpush3.bf16.xpose.msra.mxu0 %v6108_v34  ;;  %5084 = vmatpush3.bf16.xpose.msra.mxu1 %v6108_v34 }
 0x152   : > { %4941 = vmatprep.subr.bf16.mxu0 %v5689_v0  ;;  %5085 = vmatprep.subr.bf16.mxu1 %v5689_v0 }
 0x158   : > { %4186 = vmatmul.mubr.f32.vlgmr.msra.gmra.mrb[0].mxu0 %v6091_v27  ;;  %4396 = vmatmul.mubr.f32.vlgmr.msra.gmra.mrb[0].mxu1 %v6094_v28 }
 0x159   : > { %4943 = vmatpush3.bf16.xpose.msra.mxu0 %v5968_v12  ;;  %5087 = vmatpush3.bf16.xpose.msra.mxu1 %v5968_v12 }
 0x15a   : > { %4944 = vmatprep.subr.bf16.mxu0 %v5689_v0  ;;  %5088 = vmatprep.subr.bf16.mxu1 %v5689_v0 }
 0x15b   : > { %4220 = vmatprep.mubr.msk.f32.mxu0 %vm5690_vm0, %v5691_v1  ;;  %4430 = vmatprep.mubr.msk.f32.mxu1 %vm5690_vm0, %v5691_v1 }
 0x161   : > { %4946 = vmatpush3.bf16.xpose.msra.mxu0 %v5974_v17  ;;  %5090 = vmatpush3.bf16.xpose.msra.mxu1 %v5974_v17 }
 0x162   : > { %4947 = vmatprep.subr.bf16.mxu0 %v5689_v0  ;;  %5091 = vmatprep.subr.bf16.mxu1 %v5689_v0 }
 0x169   : > { %4949 = vmatpush3.bf16.xpose.msra.mxu0 %v5982_v24  ;;  %5093 = vmatpush3.bf16.xpose.msra.mxu1 %v5982_v24 }
 0x16a   : > { %4950 = vmatprep.subr.bf16.mxu0 %v5689_v0  ;;  %5094 = vmatprep.subr.bf16.mxu1 %v5689_v0 }
 0x171   : > { %4952 = vmatpush3.bf16.xpose.msra.mxu0 %v5992_v33  ;;  %5096 = vmatpush3.bf16.xpose.msra.mxu1 %v5992_v33 }
 0x172   : > { %4953 = vmatprep.subr.bf16.mxu0 %v5689_v0  ;;  %5097 = vmatprep.subr.bf16.mxu1 %v5689_v0 }
 0x179   : > { %4955 = vmatpush3.bf16.xpose.msra.mxu0 %v6040_v55  ;;  %5099 = vmatpush3.bf16.xpose.msra.mxu1 %v6040_v55 }
 0x17a   : > { %4956 = vmatprep.subr.bf16.mxu0 %v5689_v0  ;;  %5100 = vmatprep.subr.bf16.mxu1 %v5689_v0 }
 0x181   : > { %4958 = vmatpush3.bf16.xpose.msra.mxu0 %v6064_v5  ;;  %5102 = vmatpush3.bf16.xpose.msra.mxu1 %v6064_v5 }
 0x182   : > { %4959 = vmatprep.subr.bf16.mxu0 %v5689_v0  ;;  %5103 = vmatprep.subr.bf16.mxu1 %v5689_v0 }
 0x189   : > { %4961 = vmatpush3.bf16.xpose.msra.mxu0 %v6088_v23  ;;  %5105 = vmatpush3.bf16.xpose.msra.mxu1 %v6088_v23 }
 0x18a   : > { %4962 = vmatprep.subr.bf16.mxu0 %v5689_v0  ;;  %5106 = vmatprep.subr.bf16.mxu1 %v5689_v0 }
 0x191   : > { %4964 = vmatpush3.bf16.xpose.msra.mxu0 %v6112_v42  ;;  %5108 = vmatpush3.bf16.xpose.msra.mxu1 %v6112_v42 }
 0x192   : > { %4965 = vmatprep.subr.bf16.mxu0 %v5689_v0  ;;  %5109 = vmatprep.subr.bf16.mxu1 %v5689_v0 }
 0x198   : > { %4221 = vmatmul.mubr.f32.vlgmr.msra.gmra.mrb[0].mxu0 %v457_v35  ;;  %4431 = vmatmul.mubr.f32.vlgmr.msra.gmra.mrb[0].mxu1 %v1102_v37 }
 0x199   : > { %4967 = vmatpush3.bf16.xpose.msra.mxu0 %v4966_v48  ;;  %5111 = vmatpush3.bf16.xpose.msra.mxu1 %v4966_v48 }
 0x19a   : > { %4968 = vmatprep.subr.bf16.mxu0 %v5689_v0  ;;  %5112 = vmatprep.subr.bf16.mxu1 %v5689_v0 }
 0x19b   : > { %4255 = vmatprep.mubr.msk.f32.mxu0 %vm5690_vm0, %v5691_v1  ;;  %4465 = vmatprep.mubr.msk.f32.mxu1 %vm5690_vm0, %v5691_v1 }
 0x1a1   : > { %4970 = vmatpush3.bf16.xpose.msra.mxu0 %v4969_v53  ;;  %5114 = vmatpush3.bf16.xpose.msra.mxu1 %v4969_v53 }
 0x1a2   : > { %4971 = vmatprep.subr.bf16.mxu0 %v5689_v0  ;;  %5115 = vmatprep.subr.bf16.mxu1 %v5689_v0 }
 0x1a9   : > { %4973 = vmatpush3.bf16.xpose.msra.mxu0 %v4972_v54  ;;  %5117 = vmatpush3.bf16.xpose.msra.mxu1 %v4972_v54 }
 0x1aa   : > { %4974 = vmatprep.subr.bf16.mxu0 %v5689_v0  ;;  %5118 = vmatprep.subr.bf16.mxu1 %v5689_v0 }
 0x1b1   : > { %4976 = vmatpush3.bf16.xpose.msra.mxu0 %v4975_v39  ;;  %5120 = vmatpush3.bf16.xpose.msra.mxu1 %v4975_v39 }
 0x1b2   : > { %4977 = vmatprep.subr.bf16.mxu0 %v5689_v0  ;;  %5121 = vmatprep.subr.bf16.mxu1 %v5689_v0 }
 0x1b9   : > { %4979 = vmatpush3.bf16.xpose.msra.mxu0 %v4978_v40  ;;  %5123 = vmatpush3.bf16.xpose.msra.mxu1 %v4978_v40  ;;  %v1663_v32 = vpop.xlane.xlu1 %1662 }
 0x1ba   : > { %4980 = vmatprep.subr.bf16.mxu0 %v5689_v0  ;;  %5124 = vmatprep.subr.bf16.mxu1 %v5689_v0  ;;  %v1664_v34 = vmul.f32 0.125, %v1663_v32 }
 0x1c1   : > { %4982 = vmatpush3.bf16.xpose.msra.mxu0 %v4981_v43  ;;  %5126 = vmatpush3.bf16.xpose.msra.mxu1 %v4981_v43 }
 0x1c2   : > { %4983 = vmatprep.subr.bf16.mxu0 %v5689_v0  ;;  %5127 = vmatprep.subr.bf16.mxu1 %v5689_v0 }
 0x1c9   : > { %4985 = vmatpush3.bf16.xpose.msra.mxu0 %v4984_v45  ;;  %5129 = vmatpush3.bf16.xpose.msra.mxu1 %v4984_v45 }
 0x1ca   : > { %4986 = vmatprep.subr.bf16.mxu0 %v5689_v0  ;;  %5130 = vmatprep.subr.bf16.mxu1 %v5689_v0 }
 0x1d1   : > { %4988 = vmatpush3.bf16.xpose.msra.mxu0 %v4987_v46  ;;  %5132 = vmatpush3.bf16.xpose.msra.mxu1 %v4987_v46 }
 0x1d2   : > { %4989 = vmatprep.subr.bf16.mxu0 %v5689_v0  ;;  %5133 = vmatprep.subr.bf16.mxu1 %v5689_v0 }
 0x1d8   : > { %4256 = vmatmul.mubr.f32.vlgmr.msra.gmra.mrb[0].mxu0 %v6084_v21  ;;  %4466 = vmatmul.mubr.f32.vlgmr.msra.gmra.mrb[0].mxu1 %v6086_v22 }
 0x1d9   : > { %4991 = vmatpush3.bf16.xpose.msra.mxu0 %v5968_v12  ;;  %5135 = vmatpush3.bf16.xpose.msra.mxu1 %v5968_v12  ;;  %v1670_v12 = vlaneseq }
 0x1da   : > { %4992 = vmatprep.subr.bf16.mxu0 %v5689_v0  ;;  %5136 = vmatprep.subr.bf16.mxu1 %v5689_v0 }
 0x1db   : > { %4290 = vmatprep.mubr.msk.f32.mxu0 %vm5690_vm0, %v5691_v1  ;;  %4500 = vmatprep.mubr.msk.f32.mxu1 %vm5690_vm0, %v5691_v1 }
 0x1e1   : > { %4994 = vmatpush3.bf16.xpose.msra.mxu0 %v5974_v17  ;;  %5138 = vmatpush3.bf16.xpose.msra.mxu1 %v5974_v17  ;;  %v1668_v17 = vpop.xlane.xlu0 %1667 }
 0x1e2   : > { %4995 = vmatprep.subr.bf16.mxu0 %v5689_v0  ;;  %5139 = vmatprep.subr.bf16.mxu1 %v5689_v0 }
 0x1e9   : > { %4997 = vmatpush3.bf16.xpose.msra.mxu0 %v5982_v24  ;;  %5141 = vmatpush3.bf16.xpose.msra.mxu1 %v5982_v24  ;;  %v6385_v24 = vand.u32 127, %v1670_v12 }
 0x1ea   : > { %4998 = vmatprep.subr.bf16.mxu0 %v5689_v0  ;;  %5142 = vmatprep.subr.bf16.mxu1 %v5689_v0 }
 0x1eb   : > { %vm1672_vm2 = vcmp.lt.s32.totalorder %v6385_v24, 44 }
 0x1f1   : > { %5000 = vmatpush3.bf16.xpose.msra.mxu0 %v5992_v33  ;;  %5144 = vmatpush3.bf16.xpose.msra.mxu1 %v5992_v33  ;;  %v1669_v33 = vmul.f32 0.125, %v1668_v17 }
 0x1f2   : > { %5001 = vmatprep.subr.bf16.mxu0 %v5689_v0  ;;  %5145 = vmatprep.subr.bf16.mxu1 %v5689_v0 }
 0x1f9   : > { %5003 = vmatpush3.bf16.xpose.msra.mxu0 %v6040_v55  ;;  %5147 = vmatpush3.bf16.xpose.msra.mxu1 %v6040_v55 }
 0x1fa   : > { %5004 = vmatprep.subr.bf16.mxu0 %v5689_v0  ;;  %5148 = vmatprep.subr.bf16.mxu1 %v5689_v0 }
 0x201   : > { %5006 = vmatpush3.bf16.xpose.msra.mxu0 %v6064_v5  ;;  %5150 = vmatpush3.bf16.xpose.msra.mxu1 %v6064_v5 }
 0x202   : > { %5007 = vmatprep.subr.bf16.mxu0 %v5689_v0  ;;  %5151 = vmatprep.subr.bf16.mxu1 %v5689_v0 }
 0x209   : > { %5009 = vmatpush3.bf16.xpose.msra.mxu0 %v6088_v23  ;;  %5153 = vmatpush3.bf16.xpose.msra.mxu1 %v6088_v23  ;;  %v304_v23 = vld [vmem:[%s262_s15] sm:$0xff] }
 0x20a   : > { %5010 = vmatprep.subr.bf16.mxu0 %v5689_v0  ;;  %5154 = vmatprep.subr.bf16.mxu1 %v5689_v0  ;;  %v6394_v27 = vand.u32 4294901760, %v304_v23 }
 0x20c   : > { %v6399_v28 = vsub.f32 %v304_v23, %v6394_v27 }
 0x20e   : > { %v6402_v29 = vand.u32 4294901760, %v6399_v28 }
 0x210   : > { %v2014_v30 = vsub.f32 %v6399_v28, %v6402_v29 }
 0x211   : > { %5012 = vmatpush3.bf16.xpose.msra.mxu0 %v6112_v42  ;;  %5156 = vmatpush3.bf16.xpose.msra.mxu1 %v6112_v42 }
 0x212   : > { %5157 = vmatprep.subr.bf16.mxu1 %v5689_v0  ;;  %4503 = vmatprep.subr.mxu0 %v6394_v27  ;;  %v2015_v31 = vand.u32 4294901760, %v2014_v30 }
 0x218   : > { %4291 = vmatmul.mubr.f32.vlgmr.msra.gmra.mrb[0].mxu0 %v6084_v21  ;;  %4501 = vmatmul.mubr.f32.vlgmr.msra.gmra.mrb[0].mxu1 %v6086_v22 }
 0x219   : > { %4691 = vmatprep.mubr.msk.f32.mxu1 %vm5690_vm0, %v5691_v1  ;;  %4504 = vmatpush3.msra.mxu0 %v6394_v27 }
 0x21a   : > { %4529 = vmatprep.subr.mxu0 %v2015_v31 }
 0x2eb   : > { %v1011_v47 = vpop.f32.mrb[0].mxu0  ;;  %v1656_v55 = vpop.f32.mrb[0].mxu1 }
 0x2ec   : > { %v1684_v61 = vsub.f32 %v1656_v55, %v1669_v33  ;;  %v4502_v62 = vpop.f32.mrb[1].mxu1  ;;  %v1675_v63 = vsel %vm1672_vm2, %v1011_v47, -inf  ;;  %v4292_v2 = vpop.f32.mrb[1].mxu0  ;;  %v1678_v37 = vsub.f32 %v1011_v47, %v1664_v34 }
 0x2ed   : > { %1676 = vmax.xlane.f32.xlu1 %v1675_v63 }
 0x2ee   : > { %v1686_v5 = vsub.f32 %v1684_v61, %v1685_v60 }
 0x2f0   : > { %v1687_v13 = vmul.f32 1.442695, %v1686_v5 }
 0x2f2   : > { %5483 = vpow2.f32 %v1687_v13 }
 0x2fc   : > { %v5484_v14 = vpop.eup %5483 }
 0x2fd   : > { %v1689_v18 = vadd.f32 0.0001, %v5484_v14 }
 0x2ff   : > { %v1690_v21 = vmul.f32 0.15075567, %v1689_v18 }
 0x301   : > { %v1692_v22 = vsel %vm1672_vm2, %v1690_v21, 0.0 }
 0x302   : > { %1703 = vxpose.xlu0.b32.start.end [1/1] (short) %v1692_v22, 128  ;;  %v1693_v35 = vrot.slane %v1692_v22, 4 }
 0x304   : > { %v1694_v4 = vadd.f32 %v1693_v35, %v1692_v22 }
 0x306   : > { %v1695_v19 = vrot.slane %v1694_v4, 2 }
 0x308   : > { %v1696_v10 = vadd.f32 %v1695_v19, %v1694_v4 }
 0x30a   : > { %v1697_v6 = vrot.slane %v1696_v10, 1 }
 0x30c   : > { %v1698_v38 = vadd.f32 %v1697_v6, %v1696_v10 }
 0x37a   : > { %v1677_v42 = vpop.xlane.xlu1 %1676 }
 0x37b   : > { %v1679_v3 = vsub.f32 %v1678_v37, %v1677_v42 }
 0x37d   : > { %v1680_v16 = vmul.f32 1.442695, %v1679_v3 }
 0x37f   : > { %5485 = vpow2.f32 %v1680_v16 }
 0x382   : > { %v1719_v56 = vpop.trf.xlu0 }
 0x383   : > { %v1737_v57 = vsel %vm1735_vm3, %v1719_v56, 0 }
 0x384   : > { %v6407_v9 = vand.u32 4294901760, %v1737_v57 }
 0x386   : > { %v6410_v50 = vsub.f32 %v1737_v57, %v6407_v9  ;;  %v1720_v51 = vpop.trf.xlu0 }
 0x387   : > { %v1740_v11 = vsel %vm1735_vm3, %v1720_v51, 0 }
 0x388   : > { %v1852_v15 = vand.u32 4294901760, %v6410_v50  ;;  %v6414_v58 = vand.u32 4294901760, %v1740_v11 }
 0x389   : > { %v5486_v59 = vpop.eup %5485 }
 0x38a   : > { %v1682_v7 = vadd.f32 0.0001, %v5486_v59  ;;  %v6417_v8 = vsub.f32 %v1740_v11, %v6414_v58  ;;  %v1721_v20 = vpop.trf.xlu0  ;;  %v1853_v25 = vsub.f32 %v6410_v50, %v1852_v15 }
 0x38b   : > { %v1743_v26 = vsel %vm1735_vm3, %v1721_v20, 0 }
 0x38c   : > { %v1683_v48 = vmul.f32 0.15075567, %v1682_v7  ;;  %v1862_v49 = vand.u32 4294901760, %v6417_v8  ;;  %v6424_v52 = vand.u32 4294901760, %v1743_v26  ;;  %v1854_v36 = vand.u32 4294901760, %v1853_v25 }
 0x38e   : > { %v1863_v53 = vsub.f32 %v6417_v8, %v1862_v49  ;;  %v6430_v54 = vsub.f32 %v1743_v26, %v6424_v52  ;;  %4505 = vmatprep.mubr.f32.mxu0 %v1854_v36  ;;  %v1722_v39 = vpop.trf.xlu0  ;;  %v6434_v40 = vsel %vm1672_vm2, %v1683_v48, 0.0 }
 0x38f   : > { %v1746_v41 = vsel %vm1735_vm3, %v1722_v39, 0  ;;  %v1699_v43 = vmul.f32 %v1698_v38, %v6434_v40 }
 0x390   : > { %v1864_v44 = vand.u32 4294901760, %v1863_v53  ;;  %v1872_v45 = vand.u32 4294901760, %v6430_v54  ;;  %v6439_v46 = vand.u32 4294901760, %v1746_v41 }
 0x391   : > { %1700 = vadd.xlane.f32.xlu1 %v1699_v43 }
 0x392   : > { %v6442_v12 = vsub.f32 %v1746_v41, %v6439_v46  ;;  %4506 = vmatmul.mubr.f32.vlgmr.msra.gmra.mrb[2].mxu0 %v1864_v44  ;;  %v1723_v17 = vpop.trf.xlu0  ;;  %v1873_v24 = vsub.f32 %v6430_v54, %v1872_v45 }
 0x393   : > { %v1749_v33 = vsel %vm1735_vm3, %v1723_v17, 0  ;;  %4530 = vmatpush3.msra.mxu0 %v2015_v31 }
 0x394   : > { %v1882_v47 = vand.u32 4294901760, %v6442_v12  ;;  %v6449_v55 = vand.u32 4294901760, %v1749_v33  ;;  %v1874_v60 = vand.u32 4294901760, %v1873_v24  ;;  %4555 = vmatprep.subr.mxu0 %v6399_v28 }
 0x396   : > { %v6453_v61 = vsub.f32 %v1749_v33, %v6449_v55  ;;  %4508 = vmatprep.mubr.f32.mxu0 %v1874_v60  ;;  %v1724_v62 = vpop.trf.xlu0  ;;  %v1883_v63 = vsub.f32 %v6442_v12, %v1882_v47 }
 0x397   : > { %v1752_v2 = vsel %vm1735_vm3, %v1724_v62, 0 }
 0x398   : > { %v1892_v5 = vand.u32 4294901760, %v6453_v61  ;;  %v6460_v13 = vand.u32 4294901760, %v1752_v2  ;;  %v1884_v14 = vand.u32 4294901760, %v1883_v63 }
 0x39a   : > { %v6463_v18 = vsub.f32 %v1752_v2, %v6460_v13  ;;  %4509 = vmatmul.mubr.f32.gmra.mrb[4].mxu0 %v1884_v14  ;;  %v1725_v21 = vpop.trf.xlu0  ;;  %v1893_v22 = vsub.f32 %v6453_v61, %v1892_v5 }
 0x39b   : > { %v1755_v23 = vsel %vm1735_vm3, %v1725_v21, 0 }
 0x39c   : > { %v1902_v30 = vand.u32 4294901760, %v6463_v18  ;;  %v6470_v31 = vand.u32 4294901760, %v1755_v23  ;;  %v1894_v32 = vand.u32 4294901760, %v1893_v22 }
 0x39e   : > { %v6473_v34 = vsub.f32 %v1755_v23, %v6470_v31  ;;  %4511 = vmatprep.mubr.f32.mxu0 %v1894_v32  ;;  %v1726_v35 = vpop.trf.xlu0  ;;  %v1903_v37 = vsub.f32 %v6463_v18, %v1902_v30 }
 0x39f   : > { %v1758_v42 = vsel %vm1735_vm3, %v1726_v35, 0 }
 0x3a0   : > { %v1912_v3 = vand.u32 4294901760, %v6473_v34  ;;  %v6480_v4 = vand.u32 4294901760, %v1758_v42  ;;  %v1904_v16 = vand.u32 4294901760, %v1903_v37 }
 0x3a2   : > { %v6483_v19 = vsub.f32 %v1758_v42, %v6480_v4  ;;  %4512 = vmatmul.mubr.f32.gmra.mrb[6].mxu0 %v1904_v16  ;;  %v1727_v56 = vpop.trf.xlu0  ;;  %v1913_v57 = vsub.f32 %v6473_v34, %v1912_v3 }
 0x3a3   : > { %v1761_v10 = vsel %vm1735_vm3, %v1727_v56, 0 }
 0x3a4   : > { %v1922_v51 = vand.u32 4294901760, %v6483_v19  ;;  %v6490_v11 = vand.u32 4294901760, %v1761_v10  ;;  %v1914_v59 = vand.u32 4294901760, %v1913_v57 }
 0x3a6   : > { %v6493_v6 = vsub.f32 %v1761_v10, %v6490_v11  ;;  %4514 = vmatprep.mubr.f32.mxu0 %v1914_v59  ;;  %v1728_v7 = vpop.trf.xlu0  ;;  %v1923_v20 = vsub.f32 %v6483_v19, %v1922_v51 }
 0x3a7   : > { %v1764_v25 = vsel %vm1735_vm3, %v1728_v7, 0 }
 0x3a8   : > { %v1932_v26 = vand.u32 4294901760, %v6493_v6  ;;  %v6500_v48 = vand.u32 4294901760, %v1764_v25  ;;  %v1924_v36 = vand.u32 4294901760, %v1923_v20 }
 0x3aa   : > { %v6503_v38 = vsub.f32 %v1764_v25, %v6500_v48  ;;  %4515 = vmatmul.mubr.f32.gmra.mrb[8].mxu0 %v1924_v36  ;;  %v1729_v53 = vpop.trf.xlu0  ;;  %v1933_v39 = vsub.f32 %v6493_v6, %v1932_v26 }
 0x3ab   : > { %v1767_v41 = vsel %vm1735_vm3, %v1729_v53, 0 }
 0x3ac   : > { %v1942_v43 = vand.u32 4294901760, %v6503_v38  ;;  %v6510_v44 = vand.u32 4294901760, %v1767_v41  ;;  %v1934_v17 = vand.u32 4294901760, %v1933_v39 }
 0x3ae   : > { %v6513_v24 = vsub.f32 %v1767_v41, %v6510_v44  ;;  %4517 = vmatprep.mubr.f32.mxu0 %v1934_v17  ;;  %v1730_v33 = vpop.trf.xlu0  ;;  %v1943_v60 = vsub.f32 %v6503_v38, %v1942_v43 }
 0x3af   : > { %v1770_v62 = vsel %vm1735_vm3, %v1730_v33, 0 }
 0x3b0   : > { %v1952_v63 = vand.u32 4294901760, %v6513_v24  ;;  %v6520_v2 = vand.u32 4294901760, %v1770_v62  ;;  %v1944_v14 = vand.u32 4294901760, %v1943_v60 }
 0x3b2   : > { %v6523_v21 = vsub.f32 %v1770_v62, %v6520_v2  ;;  %4518 = vmatmul.mubr.f32.gmra.mrb[10].mxu0 %v1944_v14  ;;  %v1731_v22 = vpop.trf.xlu0  ;;  %v1953_v23 = vsub.f32 %v6513_v24, %v1952_v63 }
 0x3b3   : > { %v1773_v32 = vsel %vm1735_vm3, %v1731_v22, 0 }
 0x3b4   : > { %v1962_v35 = vand.u32 4294901760, %v6523_v21  ;;  %v6530_v37 = vand.u32 4294901760, %v1773_v32  ;;  %v1954_v42 = vand.u32 4294901760, %v1953_v23 }
 0x3b6   : > { %v6533_v16 = vsub.f32 %v1773_v32, %v6530_v37  ;;  %4520 = vmatprep.mubr.f32.mxu0 %v1954_v42  ;;  %v1732_v56 = vpop.trf.xlu0  ;;  %v1963_v57 = vsub.f32 %v6523_v21, %v1962_v35 }
 0x3b7   : > { %v1776_v10 = vsel %vm1735_vm3, %v1732_v56, 0 }
 0x3b8   : > { %v1972_v59 = vand.u32 4294901760, %v6533_v16  ;;  %v6540_v7 = vand.u32 4294901760, %v1776_v10  ;;  %v1964_v20 = vand.u32 4294901760, %v1963_v57 }
 0x3ba   : > { %v6543_v25 = vsub.f32 %v1776_v10, %v6540_v7  ;;  %4521 = vmatmul.mubr.f32.gmra.mrb[12].mxu0 %v1964_v20  ;;  %v1733_v36 = vpop.trf.xlu0  ;;  %v1973_v53 = vsub.f32 %v6533_v16, %v1972_v59 }
 0x3bb   : > { %v1779_v39 = vsel %vm1735_vm3, %v1733_v36, 0 }
 0x3bc   : > { %v1982_v41 = vand.u32 4294901760, %v6543_v25  ;;  %v6550_v17 = vand.u32 4294901760, %v1779_v39  ;;  %v1974_v33 = vand.u32 4294901760, %v1973_v53 }
 0x3be   : > { %v6553_v60 = vsub.f32 %v1779_v39, %v6550_v17  ;;  %4523 = vmatprep.mubr.f32.mxu0 %v1974_v33  ;;  %v1734_v62 = vpop.trf.xlu0  ;;  %v1983_v14 = vsub.f32 %v6543_v25, %v1982_v41 }
 0x3bf   : > { %v1782_v22 = vsel %vm1735_vm3, %v1734_v62, 0 }
 0x3c0   : > { %v1992_v23 = vand.u32 4294901760, %v6553_v60  ;;  %v6560_v32 = vand.u32 4294901760, %v1782_v22  ;;  %v1984_v42 = vand.u32 4294901760, %v1983_v14 }
 0x3c2   : > { %v2001_v56 = vsub.f32 %v1782_v22, %v6560_v32  ;;  %4524 = vmatmul.mubr.f32.gmra.mrb[14].mxu0 %v1984_v42  ;;  %v1993_v57 = vsub.f32 %v6553_v60, %v1992_v23 }
 0x3c4   : > { %v2002_v10 = vand.u32 4294901760, %v2001_v56  ;;  %v1994_v20 = vand.u32 4294901760, %v1993_v57 }
 0x3c6   : > { %4526 = vmatprep.mubr.f32.mxu0 %v1994_v20  ;;  %v2003_v36 = vsub.f32 %v2001_v56, %v2002_v10 }
 0x3c8   : > { %v2004_v53 = vand.u32 4294901760, %v2003_v36 }
 0x3ca   : > { %4527 = vmatmul.mubr.f32.gmra.mrb[16].mxu0 %v2004_v53 }
 0x3cb   : > { %4531 = vmatprep.mubr.f32.mxu0 %v6407_v9 }
 0x3ce   : > { %4532 = vmatmul.mubr.f32.vlgmr.msra.gmra.mrb[2].mxu0 %v6414_v58 }
 0x3cf   : > { %4556 = vmatpush3.msra.mxu0 %v6399_v28  ;;  %4534 = vmatprep.mubr.f32.mxu0 %v6424_v52 }
 0x3d0   : > { %4581 = vmatprep.subr.mxu0 %v6394_v27 }
 0x3d2   : > { %4535 = vmatmul.mubr.f32.gmra.mrb[4].mxu0 %v6439_v46 }
 0x3d3   : > { %4537 = vmatprep.mubr.f32.mxu0 %v6449_v55 }
 0x3d6   : > { %4538 = vmatmul.mubr.f32.gmra.mrb[6].mxu0 %v6460_v13 }
 0x3d7   : > { %4540 = vmatprep.mubr.f32.mxu0 %v6470_v31 }
 0x3da   : > { %4541 = vmatmul.mubr.f32.gmra.mrb[8].mxu0 %v6480_v4 }
 0x3db   : > { %4543 = vmatprep.mubr.f32.mxu0 %v6490_v11 }
 0x3de   : > { %4544 = vmatmul.mubr.f32.gmra.mrb[10].mxu0 %v6500_v48 }
 0x3df   : > { %4546 = vmatprep.mubr.f32.mxu0 %v6510_v44 }
 0x3e2   : > { %4547 = vmatmul.mubr.f32.gmra.mrb[12].mxu0 %v6520_v2 }
 0x3e3   : > { %4549 = vmatprep.mubr.f32.mxu0 %v6530_v37 }
 0x3e6   : > { %4550 = vmatmul.mubr.f32.gmra.mrb[14].mxu0 %v6540_v7 }
 0x3e7   : > { %4552 = vmatprep.mubr.f32.mxu0 %v6550_v17 }
 0x3ea   : > { %4553 = vmatmul.mubr.f32.gmra.mrb[16].mxu0 %v6560_v32 }
 0x3eb   : > { %4557 = vmatprep.mubr.f32.mxu0 %v6410_v50 }
 0x3ee   : > { %4558 = vmatmul.mubr.f32.vlgmr.msra.gmra.mrb[2].mxu0 %v6417_v8 }
 0x3ef   : > { %4582 = vmatpush3.msra.mxu0 %v6394_v27  ;;  %4560 = vmatprep.mubr.f32.mxu0 %v6430_v54 }
 0x3f0   : > { %4607 = vmatprep.subr.mxu0 %v6402_v29 }
 0x3f2   : > { %4561 = vmatmul.mubr.f32.gmra.mrb[4].mxu0 %v6442_v12 }
 0x3f3   : > { %4563 = vmatprep.mubr.f32.mxu0 %v6453_v61 }
 0x3f6   : > { %4564 = vmatmul.mubr.f32.gmra.mrb[6].mxu0 %v6463_v18 }
 0x3f7   : > { %4566 = vmatprep.mubr.f32.mxu0 %v6473_v34 }
 0x3fa   : > { %4567 = vmatmul.mubr.f32.gmra.mrb[8].mxu0 %v6483_v19 }
 0x3fb   : > { %4569 = vmatprep.mubr.f32.mxu0 %v6493_v6 }
 0x3fe   : > { %4570 = vmatmul.mubr.f32.gmra.mrb[10].mxu0 %v6503_v38 }
 0x3ff   : > { %4572 = vmatprep.mubr.f32.mxu0 %v6513_v24 }
 0x402   : > { %4573 = vmatmul.mubr.f32.gmra.mrb[12].mxu0 %v6523_v21 }
 0x403   : > { %4575 = vmatprep.mubr.f32.mxu0 %v6533_v16 }
 0x406   : > { %4576 = vmatmul.mubr.f32.gmra.mrb[14].mxu0 %v6543_v25 }
 0x407   : > { %4578 = vmatprep.mubr.f32.mxu0 %v6553_v60 }
 0x40a   : > { %4579 = vmatmul.mubr.f32.gmra.mrb[16].mxu0 %v2001_v56 }
 0x40b   : > { %4583 = vmatprep.mubr.f32.mxu0 %v1852_v15 }
 0x40e   : > { %4584 = vmatmul.mubr.f32.vlgmr.msra.gmra.mrb[2].mxu0 %v1862_v49 }
 0x40f   : > { %4608 = vmatpush3.msra.mxu0 %v6402_v29  ;;  %4586 = vmatprep.mubr.f32.mxu0 %v1872_v45 }
 0x410   : > { %4633 = vmatprep.subr.mxu0 %v6394_v27 }
 0x412   : > { %4587 = vmatmul.mubr.f32.gmra.mrb[4].mxu0 %v1882_v47 }
 0x413   : > { %4589 = vmatprep.mubr.f32.mxu0 %v1892_v5 }
 0x416   : > { %4590 = vmatmul.mubr.f32.gmra.mrb[6].mxu0 %v1902_v30 }
 0x417   : > { %4592 = vmatprep.mubr.f32.mxu0 %v1912_v3 }
 0x41a   : > { %4593 = vmatmul.mubr.f32.gmra.mrb[8].mxu0 %v1922_v51 }
 0x41b   : > { %4595 = vmatprep.mubr.f32.mxu0 %v1932_v26 }
 0x41e   : > { %4596 = vmatmul.mubr.f32.gmra.mrb[10].mxu0 %v1942_v43 }
 0x41f   : > { %4598 = vmatprep.mubr.f32.mxu0 %v1952_v63 }
 0x422   : > { %4599 = vmatmul.mubr.f32.gmra.mrb[12].mxu0 %v1962_v35 }
 0x423   : > { %4601 = vmatprep.mubr.f32.mxu0 %v1972_v59 }
 0x426   : > { %4602 = vmatmul.mubr.f32.gmra.mrb[14].mxu0 %v1982_v41 }
 0x427   : > { %4604 = vmatprep.mubr.f32.mxu0 %v1992_v23 }
 0x42a   : > { %4605 = vmatmul.mubr.f32.gmra.mrb[16].mxu0 %v2002_v10 }
 0x42b   : > { %4609 = vmatprep.mubr.f32.mxu0 %v6407_v9 }
 0x42e   : > { %4610 = vmatmul.mubr.f32.vlgmr.msra.gmra.mrb[2].mxu0 %v6414_v58 }
 0x42f   : > { %4634 = vmatpush3.msra.mxu0 %v6394_v27  ;;  %4612 = vmatprep.mubr.f32.mxu0 %v6424_v52 }
 0x432   : > { %4613 = vmatmul.mubr.f32.gmra.mrb[4].mxu0 %v6439_v46 }
 0x433   : > { %4615 = vmatprep.mubr.f32.mxu0 %v6449_v55 }
 0x436   : > { %4616 = vmatmul.mubr.f32.gmra.mrb[6].mxu0 %v6460_v13 }
 0x437   : > { %4618 = vmatprep.mubr.f32.mxu0 %v6470_v31 }
 0x43a   : > { %4619 = vmatmul.mubr.f32.gmra.mrb[8].mxu0 %v6480_v4 }
 0x43b   : > { %4621 = vmatprep.mubr.f32.mxu0 %v6490_v11 }
 0x43e   : > { %4622 = vmatmul.mubr.f32.gmra.mrb[10].mxu0 %v6500_v48 }
 0x43f   : > { %4624 = vmatprep.mubr.f32.mxu0 %v6510_v44 }
 0x442   : > { %4625 = vmatmul.mubr.f32.gmra.mrb[12].mxu0 %v6520_v2 }
 0x443   : > { %4627 = vmatprep.mubr.f32.mxu0 %v6530_v37 }
 0x446   : > { %4628 = vmatmul.mubr.f32.gmra.mrb[14].mxu0 %v6540_v7 }
 0x447   : > { %4630 = vmatprep.mubr.f32.mxu0 %v6550_v17 }
 0x44a   : > { %4631 = vmatmul.mubr.f32.gmra.mrb[16].mxu0 %v6560_v32 }
 0x44b   : > { %4635 = vmatprep.mubr.f32.mxu0 %v6407_v9 }
 0x44e   : > { %4636 = vmatmul.mubr.f32.vlgmr.msra.gmra.mrb[2].mxu0 %v6414_v58 }
 0x44f   : > { %4638 = vmatprep.mubr.f32.mxu0 %v6424_v52 }
 0x452   : > { %4639 = vmatmul.mubr.f32.gmra.mrb[4].mxu0 %v6439_v46 }
 0x453   : > { %4641 = vmatprep.mubr.f32.mxu0 %v6449_v55 }
 0x456   : > { %4642 = vmatmul.mubr.f32.gmra.mrb[6].mxu0 %v6460_v13 }
 0x457   : > { %4644 = vmatprep.mubr.f32.mxu0 %v6470_v31 }
 0x45a   : > { %4645 = vmatmul.mubr.f32.gmra.mrb[8].mxu0 %v6480_v4 }
 0x45b   : > { %4647 = vmatprep.mubr.f32.mxu0 %v6490_v11 }
 0x45e   : > { %4648 = vmatmul.mubr.f32.gmra.mrb[10].mxu0 %v6500_v48 }
 0x45f   : > { %4650 = vmatprep.mubr.f32.mxu0 %v6510_v44 }
 0x462   : > { %4651 = vmatmul.mubr.f32.gmra.mrb[12].mxu0 %v6520_v2 }
 0x463   : > { %4653 = vmatprep.mubr.f32.mxu0 %v6530_v37 }
 0x466   : > { %4654 = vmatmul.mubr.f32.gmra.mrb[14].mxu0 %v6540_v7 }
 0x467   : > { %4656 = vmatprep.mubr.f32.mxu0 %v6550_v17 }
 0x46a   : > { %4657 = vmatmul.mubr.f32.gmra.mrb[16].mxu0 %v6560_v32 }
 0x521   : > { %v4637_v27 = vpop.f32.mrb[2].mxu0 }
 0x522   : > { %v2879_v28 = vand.u32 4294901760, %v4637_v27  ;;  %v2781_v29 = vpop.f32.mrb[3].mxu0 }
 0x523   : > { %v2876_v9 = vand.u32 4294901760, %v2781_v29 }
 0x524   : > { %v6666_v50 = vsub.f32 %v4637_v27, %v2879_v28  ;;  %v6730_v27 = vand.u32 4294901760, %v6434_v40 }
 0x525   : > { %v6668_v15 = vpack.c.bf16 %v2879_v28, %v2876_v9  ;;  %v6670_v58 = vsub.f32 %v2781_v29, %v2876_v9  ;;  %v4640_v8 = vpop.f32.mrb[4].mxu0 }
 0x526   : > { %v2976_v49 = vand.u32 4294901760, %v6666_v50  ;;  %v2885_v52 = vand.u32 4294901760, %v4640_v8  ;;  %v2793_v54 = vpop.f32.mrb[5].mxu0 }
 0x527   : > { %v2969_v45 = vand.u32 4294901760, %v6670_v58  ;;  %v5206_v46 = vpack.c.bf16 %v6666_v50, %v6670_v58  ;;  %v2882_v12 = vand.u32 4294901760, %v2793_v54  ;;  %5159 = vmatpush3.bf16.msra.mxu1 %v6668_v15 }
 0x528   : > { %v2977_v47 = vsub.f32 %v6666_v50, %v2976_v49  ;;  %v6678_v55 = vsub.f32 %v4640_v8, %v2885_v52  ;;  %5160 = vmatprep.subr.bf16.mxu1 %v5689_v0 }
 0x529   : > { %v2970_v61 = vsub.f32 %v6670_v58, %v2969_v45  ;;  %v6682_v5 = vpack.c.bf16 %v2885_v52, %v2882_v12  ;;  %v6684_v13 = vsub.f32 %v2793_v54, %v2882_v12  ;;  %v4643_v18 = vpop.f32.mrb[6].mxu0  ;;  %v6686_v30 = vpack.c.bf16 %v2976_v49, %v2969_v45 }
 0x52a   : > { %v2978_v31 = vand.u32 4294901760, %v2977_v47  ;;  %v2990_v34 = vand.u32 4294901760, %v6678_v55  ;;  %v2891_v3 = vand.u32 4294901760, %v4643_v18  ;;  %v2805_v4 = vpop.f32.mrb[7].mxu0 }
 0x52b   : > { %v2971_v19 = vand.u32 4294901760, %v2970_v61  ;;  %v2983_v51 = vand.u32 4294901760, %v6684_v13  ;;  %v5209_v11 = vpack.c.bf16 %v6678_v55, %v6684_v13  ;;  %v2888_v6 = vand.u32 4294901760, %v2805_v4  ;;  %5162 = vmatpush3.bf16.msra.mxu1 %v6682_v5 }
 0x52c   : > { %v2991_v26 = vsub.f32 %v6678_v55, %v2990_v34  ;;  %v6694_v48 = vsub.f32 %v4643_v18, %v2891_v3  ;;  %5163 = vmatprep.subr.bf16.mxu1 %v5689_v0 }
 0x52d   : > { %v2984_v38 = vsub.f32 %v6684_v13, %v2983_v51  ;;  %v6698_v43 = vpack.c.bf16 %v2891_v3, %v2888_v6  ;;  %v6700_v44 = vsub.f32 %v2805_v4, %v2888_v6  ;;  %v4646_v24 = vpop.f32.mrb[8].mxu0  ;;  %v6702_v63 = vpack.c.bf16 %v2978_v31, %v2971_v19 }
 0x52e   : > { %v2992_v2 = vand.u32 4294901760, %v2991_v26  ;;  %v3004_v21 = vand.u32 4294901760, %v6694_v48  ;;  %v2897_v35 = vand.u32 4294901760, %v4646_v24  ;;  %v2817_v37 = vpop.f32.mrb[9].mxu0  ;;  %v6705_v16 = vpack.c.bf16 %v2990_v34, %v2983_v51 }
 0x52f   : > { %v2985_v59 = vand.u32 4294901760, %v2984_v38  ;;  %v2997_v7 = vand.u32 4294901760, %v6700_v44  ;;  %v5212_v25 = vpack.c.bf16 %v6694_v48, %v6700_v44  ;;  %v2894_v39 = vand.u32 4294901760, %v2817_v37  ;;  %5165 = vmatpush3.bf16.msra.mxu1 %v6698_v43 }
 0x530   : > { %v3005_v41 = vsub.f32 %v6694_v48, %v3004_v21  ;;  %v6712_v17 = vsub.f32 %v4646_v24, %v2897_v35  ;;  %5166 = vmatprep.subr.bf16.mxu1 %v5689_v0  ;;  %v6752_v19 = vsub.f32 %v6434_v40, %v6730_v27 }
 0x531   : > { %v2998_v33 = vsub.f32 %v6700_v44, %v2997_v7  ;;  %v6716_v60 = vpack.c.bf16 %v2897_v35, %v2894_v39  ;;  %v6718_v62 = vsub.f32 %v2817_v37, %v2894_v39  ;;  %v4649_v14 = vpop.f32.mrb[10].mxu0  ;;  %v6720_v22 = vpack.c.bf16 %v2992_v2, %v2985_v59 }
 0x532   : > { %v3006_v23 = vand.u32 4294901760, %v3005_v41  ;;  %v3018_v32 = vand.u32 4294901760, %v6712_v17  ;;  %v2903_v42 = vand.u32 4294901760, %v4649_v14  ;;  %v2829_v56 = vpop.f32.mrb[11].mxu0  ;;  %v6723_v57 = vpack.c.bf16 %v3004_v21, %v2997_v7 }
 0x533   : > { %v2999_v10 = vand.u32 4294901760, %v2998_v33  ;;  %v3011_v20 = vand.u32 4294901760, %v6718_v62  ;;  %v5215_v36 = vpack.c.bf16 %v6712_v17, %v6718_v62  ;;  %v2900_v53 = vand.u32 4294901760, %v2829_v56  ;;  %5168 = vmatpush3.bf16.msra.mxu1 %v6716_v60 }
 0x534   : > { %v3019_v28 = vsub.f32 %v6712_v17, %v3018_v32  ;;  %v6733_v29 = vsub.f32 %v4649_v14, %v2903_v42  ;;  %5169 = vmatprep.subr.bf16.mxu1 %v5689_v0 }
 0x535   : > { %v3012_v9 = vsub.f32 %v6718_v62, %v3011_v20  ;;  %v6737_v8 = vpack.c.bf16 %v2903_v42, %v2900_v53  ;;  %v6739_v49 = vsub.f32 %v2829_v56, %v2900_v53  ;;  %v4652_v52 = vpop.f32.mrb[12].mxu0  ;;  %v6741_v54 = vpack.c.bf16 %v3006_v23, %v2999_v10 }
 0x536   : > { %v3020_v45 = vand.u32 4294901760, %v3019_v28  ;;  %v3032_v12 = vand.u32 4294901760, %v6733_v29  ;;  %v2909_v47 = vand.u32 4294901760, %v4652_v52  ;;  %v2841_v61 = vpop.f32.mrb[13].mxu0  ;;  %v6744_v18 = vpack.c.bf16 %v3018_v32, %v3011_v20 }
 0x537   : > { %v3013_v31 = vand.u32 4294901760, %v3012_v9  ;;  %v3025_v34 = vand.u32 4294901760, %v6739_v49  ;;  %v2906_v4 = vand.u32 4294901760, %v2841_v61  ;;  %5171 = vmatpush3.bf16.msra.mxu1 %v6737_v8  ;;  %v6973_v42 = vand.u32 4294901760, %v6752_v19 }
 0x538   : > { %v3033_v51 = vsub.f32 %v6733_v29, %v3032_v12  ;;  %v6755_v6 = vsub.f32 %v4652_v52, %v2909_v47  ;;  %5172 = vmatprep.subr.bf16.mxu1 %v5689_v0  ;;  %v6999_v50 = vpack.c.bf16 %v6733_v29, %v6739_v49 }
 0x539   : > { %v3026_v26 = vsub.f32 %v6739_v49, %v3025_v34  ;;  %v6759_v38 = vpack.c.bf16 %v2909_v47, %v2906_v4  ;;  %v6761_v24 = vsub.f32 %v2841_v61, %v2906_v4  ;;  %v4655_v2 = vpop.f32.mrb[14].mxu0  ;;  %v5191_v21 = vpack.c.bf16 %v3020_v45, %v3013_v31 }
 0x53a   : > { %v3034_v35 = vand.u32 4294901760, %v3033_v51  ;;  %v3046_v37 = vand.u32 4294901760, %v6755_v6  ;;  %v2915_v59 = vand.u32 4294901760, %v4655_v2  ;;  %v2853_v40 = vpop.f32.mrb[15].mxu0  ;;  %v6764_v7 = vpack.c.bf16 %v3032_v12, %v3025_v34 }
 0x53b   : > { %v3027_v39 = vand.u32 4294901760, %v3026_v26  ;;  %v3039_v41 = vand.u32 4294901760, %v6761_v24  ;;  %v2912_v14 = vand.u32 4294901760, %v2853_v40  ;;  %5174 = vmatpush3.bf16.msra.mxu1 %v6759_v38  ;;  %v7000_v58 = vpack.c.bf16 %v6755_v6, %v6761_v24 }
 0x53c   : > { %v3047_v23 = vsub.f32 %v6755_v6, %v3046_v37  ;;  %v6771_v32 = vsub.f32 %v4655_v2, %v2915_v59  ;;  %5175 = vmatprep.subr.bf16.mxu1 %v5689_v0  ;;  %v2959_v2 = vsub.f32 %v6752_v19, %v6973_v42 }
 0x53d   : > { %v3040_v56 = vsub.f32 %v6761_v24, %v3039_v41  ;;  %v6776_v10 = vpack.c.bf16 %v2915_v59, %v2912_v14  ;;  %v6778_v20 = vsub.f32 %v2853_v40, %v2912_v14  ;;  %v4658_v53 = vpop.f32.mrb[16].mxu0  ;;  %v5194_v28 = vpack.c.bf16 %v3034_v35, %v3027_v39 }
 0x53e   : > { %v3048_v9 = vand.u32 4294901760, %v3047_v23  ;;  %v3060_v52 = vand.u32 4294901760, %v6771_v32  ;;  %v2921_v45 = vand.u32 4294901760, %v4658_v53  ;;  %v2865_v12 = vpop.f32.mrb[17].mxu0  ;;  %v6781_v47 = vpack.c.bf16 %v3046_v37, %v3039_v41 }
 0x53f   : > { %v3041_v61 = vand.u32 4294901760, %v3040_v56  ;;  %v3053_v31 = vand.u32 4294901760, %v6778_v20  ;;  %v5224_v34 = vpack.c.bf16 %v6771_v32, %v6778_v20  ;;  %v2918_v4 = vand.u32 4294901760, %v2865_v12  ;;  %5177 = vmatpush3.bf16.msra.mxu1 %v6776_v10 }
 0x540   : > { %v3061_v51 = vsub.f32 %v6771_v32, %v3060_v52  ;;  %v3073_v26 = vsub.f32 %v4658_v53, %v2921_v45  ;;  %5178 = vmatprep.subr.bf16.mxu1 %v5689_v0  ;;  %v2960_v33 = vand.u32 4294901760, %v2959_v2 }
 0x541   : > { %v3054_v35 = vsub.f32 %v6778_v20, %v3053_v31  ;;  %v6793_v37 = vpack.c.bf16 %v2921_v45, %v2918_v4  ;;  %v3066_v59 = vsub.f32 %v2865_v12, %v2918_v4  ;;  %v5197_v40 = vpack.c.bf16 %v3048_v9, %v3041_v61 }
 0x542   : > { %v3062_v39 = vand.u32 4294901760, %v3061_v51  ;;  %v3074_v41 = vand.u32 4294901760, %v3073_v26  ;;  %v6795_v14 = vpack.c.bf16 %v3060_v52, %v3053_v31 }
 0x543   : > { %v3055_v23 = vand.u32 4294901760, %v3054_v35  ;;  %v3067_v56 = vand.u32 4294901760, %v3066_v59  ;;  %v5227_v32 = vpack.c.bf16 %v3073_v26, %v3066_v59  ;;  %5180 = vmatpush3.bf16.msra.mxu1 %v6793_v37 }
 0x544   : > { %v3075_v53 = vsub.f32 %v3073_v26, %v3074_v41  ;;  %5181 = vmatprep.subr.bf16.mxu1 %v5689_v0 }
 0x545   : > { %v3068_v42 = vsub.f32 %v3066_v59, %v3067_v56  ;;  %v6799_v3 = vpack.c.bf16 %v3074_v41, %v3067_v56  ;;  %v5200_v20 = vpack.c.bf16 %v3062_v39, %v3055_v23 }
 0x546   : > { %v3076_v45 = vand.u32 4294901760, %v3075_v53  ;;  %4692 = vmatmul.mubr.f32.vlgmr.msra.gmra.mrb[2].mxu1 %v2960_v33 }
 0x547   : > { %v3069_v9 = vand.u32 4294901760, %v3068_v42  ;;  %5183 = vmatpush3.bf16.msra.mxu1 %v6702_v63  ;;  %4726 = vmatprep.mubr.msk.f32.mxu1 %vm5690_vm0, %v5691_v1 }
 0x548   : > { %5184 = vmatprep.subr.bf16.mxu1 %v5689_v0 }
 0x549   : > { %v5203_v52 = vpack.c.bf16 %v3076_v45, %v3069_v9 }
 0x54b   : > { %5186 = vmatpush3.bf16.msra.mxu1 %v6720_v22 }
 0x54c   : > { %5187 = vmatprep.subr.bf16.mxu1 %v5689_v0 }
 0x54f   : > { %5189 = vmatpush3.bf16.msra.mxu1 %v6741_v54 }
 0x550   : > { %5190 = vmatprep.subr.bf16.mxu1 %v5689_v0 }
 0x553   : > { %5192 = vmatpush3.bf16.msra.mxu1 %v5191_v21 }
 0x554   : > { %5193 = vmatprep.subr.bf16.mxu1 %v5689_v0 }
 0x557   : > { %5195 = vmatpush3.bf16.msra.mxu1 %v5194_v28 }
 0x558   : > { %5196 = vmatprep.subr.bf16.mxu1 %v5689_v0 }
 0x55b   : > { %5198 = vmatpush3.bf16.msra.mxu1 %v5197_v40 }
 0x55c   : > { %5199 = vmatprep.subr.bf16.mxu1 %v5689_v0 }
 0x55f   : > { %5201 = vmatpush3.bf16.msra.mxu1 %v5200_v20 }
 0x560   : > { %5202 = vmatprep.subr.bf16.mxu1 %v5689_v0 }
 0x563   : > { %5204 = vmatpush3.bf16.msra.mxu1 %v5203_v52 }
 0x564   : > { %5205 = vmatprep.subr.bf16.mxu1 %v5689_v0 }
 0x566   : > { %4727 = vmatmul.mubr.f32.vlgmr.msra.gmra.mrb[2].mxu1 %v6730_v27 }
 0x567   : > { %5207 = vmatpush3.bf16.msra.mxu1 %v5206_v46  ;;  %4761 = vmatprep.mubr.msk.f32.mxu1 %vm5690_vm0, %v5691_v1  ;;  %v7001_v46 = vand.u32 4294901760, %v6752_v19 }
 0x568   : > { %5208 = vmatprep.subr.bf16.mxu1 %v5689_v0 }
 0x56b   : > { %5210 = vmatpush3.bf16.msra.mxu1 %v5209_v11 }
 0x56c   : > { %5211 = vmatprep.subr.bf16.mxu1 %v5689_v0 }
 0x56f   : > { %5213 = vmatpush3.bf16.msra.mxu1 %v5212_v25 }
 0x570   : > { %5214 = vmatprep.subr.bf16.mxu1 %v5689_v0 }
 0x573   : > { %5216 = vmatpush3.bf16.msra.mxu1 %v5215_v36 }
 0x574   : > { %5217 = vmatprep.subr.bf16.mxu1 %v5689_v0 }
 0x577   : > { %5219 = vmatpush3.bf16.msra.mxu1 %v6999_v50 }
 0x578   : > { %5220 = vmatprep.subr.bf16.mxu1 %v5689_v0 }
 0x57b   : > { %5222 = vmatpush3.bf16.msra.mxu1 %v7000_v58 }
 0x57c   : > { %5223 = vmatprep.subr.bf16.mxu1 %v5689_v0 }
 0x57f   : > { %5225 = vmatpush3.bf16.msra.mxu1 %v5224_v34 }
 0x580   : > { %5226 = vmatprep.subr.bf16.mxu1 %v5689_v0 }
 0x583   : > { %5228 = vmatpush3.bf16.msra.mxu1 %v5227_v32 }
 0x584   : > { %5229 = vmatprep.subr.bf16.mxu1 %v5689_v0 }
 0x586   : > { %4762 = vmatmul.mubr.f32.vlgmr.msra.gmra.mrb[2].mxu1 %v6752_v19 }
 0x587   : > { %5231 = vmatpush3.bf16.msra.mxu1 %v6668_v15  ;;  %4796 = vmatprep.mubr.msk.f32.mxu1 %vm5690_vm0, %v5691_v1 }
 0x588   : > { %5232 = vmatprep.subr.bf16.mxu1 %v5689_v0 }
 0x58b   : > { %5234 = vmatpush3.bf16.msra.mxu1 %v6682_v5 }
 0x58c   : > { %5235 = vmatprep.subr.bf16.mxu1 %v5689_v0 }
 0x58f   : > { %5237 = vmatpush3.bf16.msra.mxu1 %v6698_v43 }
 0x590   : > { %5238 = vmatprep.subr.bf16.mxu1 %v5689_v0 }
 0x593   : > { %5240 = vmatpush3.bf16.msra.mxu1 %v6716_v60 }
 0x594   : > { %5241 = vmatprep.subr.bf16.mxu1 %v5689_v0 }
 0x597   : > { %5243 = vmatpush3.bf16.msra.mxu1 %v6737_v8 }
 0x598   : > { %5244 = vmatprep.subr.bf16.mxu1 %v5689_v0 }
 0x59b   : > { %5246 = vmatpush3.bf16.msra.mxu1 %v6759_v38 }
 0x59c   : > { %5247 = vmatprep.subr.bf16.mxu1 %v5689_v0 }
 0x59f   : > { %5249 = vmatpush3.bf16.msra.mxu1 %v6776_v10 }
 0x5a0   : > { %5250 = vmatprep.subr.bf16.mxu1 %v5689_v0 }
 0x5a3   : > { %5252 = vmatpush3.bf16.msra.mxu1 %v6793_v37 }
 0x5a4   : > { %5253 = vmatprep.subr.bf16.mxu1 %v5689_v0 }
 0x5a6   : > { %4797 = vmatmul.mubr.f32.vlgmr.msra.gmra.mrb[2].mxu1 %v7001_v46 }
 0x5a7   : > { %5255 = vmatpush3.bf16.msra.mxu1 %v6686_v30  ;;  %4831 = vmatprep.mubr.msk.f32.mxu1 %vm5690_vm0, %v5691_v1 }
 0x5a8   : > { %5256 = vmatprep.subr.bf16.mxu1 %v5689_v0 }
 0x5ab   : > { %5258 = vmatpush3.bf16.msra.mxu1 %v6705_v16 }
 0x5ac   : > { %5259 = vmatprep.subr.bf16.mxu1 %v5689_v0 }
 0x5af   : > { %5261 = vmatpush3.bf16.msra.mxu1 %v6723_v57 }
 0x5b0   : > { %5262 = vmatprep.subr.bf16.mxu1 %v5689_v0 }
 0x5b3   : > { %5264 = vmatpush3.bf16.msra.mxu1 %v6744_v18 }
 0x5b4   : > { %5265 = vmatprep.subr.bf16.mxu1 %v5689_v0 }
 0x5b7   : > { %5267 = vmatpush3.bf16.msra.mxu1 %v6764_v7 }
 0x5b8   : > { %5268 = vmatprep.subr.bf16.mxu1 %v5689_v0 }
 0x5bb   : > { %5270 = vmatpush3.bf16.msra.mxu1 %v6781_v47 }
 0x5bc   : > { %5271 = vmatprep.subr.bf16.mxu1 %v5689_v0 }
 0x5bf   : > { %5273 = vmatpush3.bf16.msra.mxu1 %v6795_v14 }
 0x5c0   : > { %5274 = vmatprep.subr.bf16.mxu1 %v5689_v0 }
 0x5c3   : > { %5276 = vmatpush3.bf16.msra.mxu1 %v6799_v3 }
 0x5c4   : > { %5277 = vmatprep.subr.bf16.mxu1 %v5689_v0 }
 0x5c6   : > { %4832 = vmatmul.mubr.f32.vlgmr.msra.gmra.mrb[2].mxu1 %v6730_v27 }
 0x5c7   : > { %5279 = vmatpush3.bf16.msra.mxu1 %v6668_v15  ;;  %4866 = vmatprep.mubr.msk.f32.mxu1 %vm5690_vm0, %v5691_v1  ;;  %v1701_v1 = vpop.xlane.xlu1 %1700 }
 0x5c8   : > { %5280 = vmatprep.subr.bf16.mxu1 %v5689_v0  ;;  %5487 = vrcp.f32 %v1701_v1 }
 0x5cb   : > { %5282 = vmatpush3.bf16.msra.mxu1 %v6682_v5 }
 0x5cc   : > { %5283 = vmatprep.subr.bf16.mxu1 %v5689_v0 }
 0x5cf   : > { %5285 = vmatpush3.bf16.msra.mxu1 %v6698_v43 }
 0x5d0   : > { %5286 = vmatprep.subr.bf16.mxu1 %v5689_v0 }
 0x5d2   : > { %v5488_v15 = vpop.eup %5487 }
 0x5d3   : > { %5288 = vmatpush3.bf16.msra.mxu1 %v6716_v60 }
 0x5d4   : > { %5289 = vmatprep.subr.bf16.mxu1 %v5689_v0 }
 0x5d7   : > { %5291 = vmatpush3.bf16.msra.mxu1 %v6737_v8 }
 0x5d8   : > { %5292 = vmatprep.subr.bf16.mxu1 %v5689_v0 }
 0x5db   : > { %5294 = vmatpush3.bf16.msra.mxu1 %v6759_v38 }
 0x5dc   : > { %5295 = vmatprep.subr.bf16.mxu1 %v5689_v0 }
 0x5df   : > { %5297 = vmatpush3.bf16.msra.mxu1 %v6776_v10 }
 0x5e0   : > { %5298 = vmatprep.subr.bf16.mxu1 %v5689_v0 }
 0x5e3   : > { %5300 = vmatpush3.bf16.msra.mxu1 %v6793_v37 }
 0x5e6   : > { %4867 = vmatmul.mubr.f32.vlgmr.msra.gmra.mrb[2].mxu1 %v6730_v27 }
 0x6b9   : > { %v3512_v55 = vpop.f32.mrb[2].mxu1 }
 0x6ba   : > { %v3516_v5 = vmul.f32 %v5488_v15, %v3512_v55  ;;  %v4868_v13 = vpop.f32.mrb[3].mxu1 }
 0x6bc   : > { %3517 = vst.msk [vmem:[%s300_s20] sm:$0xff] %vm322_vm1, %v3516_v5 }
 0x6bd   : > { %5620 = shalt.err (!%p5617_p10)
}
 0x6be   : > { %s5621_s28 = scalar_lea.hbm %s6906_s11, 128  ;;  %s5625_s16 = scalar_lea.hbm %s6955_s5, 512 }
 0x6bf   : > { %p5622_p0 = scmp.ne.s32.totalorder %s6906_s11, %s5621_s28  ;;  %p5626_p7 = scmp.lt.u32.totalorder %s6906_s11, %s6955_s5 }
 0x6c0   : > { %p5627_p1 = scmp.lt.u32.totalorder %s5625_s16, %s5621_s28  ;;  %p5629_p3 = scmp.lt.u32.totalorder %s5621_s28, %s6906_s11 }
 0x6c1   : > { %p5623_p13 = pnand %p5622_p0, %p7002_p8 }
 0x6c2   : > { %p5628_p2 = por %p5627_p1, %p5626_p7 }
 0x6c3   : > { %p5624_p12 = pneg %p5623_p13 }
 0x6c4   : > { %p5630_p11 = por %p5629_p3, %p5628_p2 }
 0x6c6   : > { %p5631_p5 = pnand %p5630_p11, %p5624_p12 }
 0x6c8   : > { %5634 = shalt.err (!%p5631_p5)
}
 0x6c9   : > { %5421 = dma.vmem_to_hbm [thread:$0]  (%p7002_p8), %s6908_s23, 128, %s6906_s11, %s3519_s10  }
 0x6ca PF: > { %s7003_s17 = sld [smem:[#allocation18_spill]]  ;;  %s7004_s25 = sld [smem:[#allocation17_spill]] }
 0x6cb   : > { %s7005_s27 = sld [smem:[#allocation21_spill]] }
 0x6d0   : > { %p5444_p9 = scmp.ge.s32.totalorder %s7003_s17, 2  ;;  %s3544_s30 = sand.u32 1, %s7004_s25  }
 0x6d1   : > { %p7006_p4 = scmp.ne.s32.totalorder %s7005_s27, 0  ;;  %s3545_s12 = scalar_lea.sflag [#allocation6], %s3544_s30 }
 0x6d3   : > { %p5438_p6 = pnand %p5444_p9, %p7006_p4 }
 0x6d5   : > { %5664 = dma.done.wait (!%p5438_p6), %s3545_s12, 128  }
 0x6d6   : > { %5666 = vsyncadd (!%p5438_p6), %s3545_s12, 4294967168  ;;  %s7007_s23 = sld [smem:[#allocation19_spill]]  ;;  %s7008_s15 = sld [smem:[#allocation20_spill]] }
 0x6d7   : > { %s7009_s20 = smov %s5673_s21  ;;  %s7010_s21 = smov %s5677_s22 }
 0x6dc   : > { %p23_p10 = scmp.ge.s32.totalorder %s7007_s23, 6   ;;  %s7011_s22 = smov %s7008_s15 }
 0x6de   :  { %25 = sbr.rel (!%p23_p10) target bundleno = 11 (0xb), region = 109 }
 0x6e5   :  { %3550 = vsyncpa [#allocation5], 1 }
 0x6e6   :  { %3552 = vsyncpa [#allocation5 + $0x1], 1 }
 0x6e7   :  { %3553 = vsyncpa [#allocation8], 1 }
 0x6e8   :  { %3555 = vsyncpa [#allocation8 + $0x1], 1 }
 0x6e9   :  { %3556 = vsyncpa [#allocation11], 1 }
 0x6ea   :  { %3557 = vsyncpa [#allocation6], 1 }
 0x6eb   :  { %3559 = vsyncpa [#allocation6 + $0x1], 1 }

</bundles_post_ra>
